<compile_context>
chip_gen: v6e
topology: v6e:2x2x1
jax: 0.10.0
libtpu: 0.0.40
codegen_flags: <defaults>
</compile_context>

<pallas_src>
import functools
import math

import jax
import jax.numpy as jnp
from jax.experimental import pallas as pl
from jax.experimental.pallas import tpu as pltpu


def _round_up(x, m):
    return ((x + m - 1) // m) * m


def _is_v5e():
    """Best-effort chip detection; falls back to the fused path if unsure."""
    try:
        kind = jax.devices()[0].device_kind.lower()
    except Exception:
        return False
    return ("v5e" in kind) or ("v5 lite" in kind) or ("v5litepod" in kind)


# ------------------------------ Pallas kernels -------------------------------


def _minmax_tile_kernel(frames_ref, basis_ref, tmin_ref, tmax_ref):
    """Fused-path pass 1: power spectrum of one row tile; emit only (8, NF_PAD)
    elementwise min/max partials (no spectrogram written back to HBM).

    frames_ref: (TILE_R, n_fft)      bf16 STFT frames (window/norm folded into basis)
    basis_ref:  (n_fft, 2 * NF_PAD)  bf16 [cos | sin] real-DFT basis (VMEM resident)
    tmin_ref / tmax_ref: (8, NF_PAD) f32 per-tile partial min / max
    """
    nf = tmin_ref.shape[-1]
    xc = jnp.dot(frames_ref[...], basis_ref[...],
                 preferred_element_type=jnp.float32)          # MXU bf16 in / f32 acc
    re = xc[:, :nf]
    im = xc[:, nf:]
    spec = re * re + im * im                                   # power spectrum (VPU)
    g = spec.shape[0] // 8
    spec3 = spec.reshape(g, 8, nf)                             # row-group view (free)
    tmin_ref[...] = jnp.min(spec3, axis=0)                     # elementwise VPU mins
    tmax_ref[...] = jnp.max(spec3, axis=0)


def _fused_norm_kernel(scale_ref, frames_ref, basis_ref, out_ref):
    """Fused-path pass 2: recompute the bit-identical power spectrum and write the
    normalized, lane-dense (TILE_R, NF_PAD) output directly.

    scale_ref: (2,) f32 in SMEM -> [global_min, 1/(max - min)]
    """
    nf = out_ref.shape[-1]
    xc = jnp.dot(frames_ref[...], basis_ref[...],
                 preferred_element_type=jnp.float32)
    re = xc[:, :nf]
    im = xc[:, nf:]
    spec = re * re + im * im
    out_ref[...] = (spec - scale_ref[0]) * scale_ref[1]


def _spec_store_tile_kernel(frames_ref, basis_ref, spec_ref, tmin_ref, tmax_ref):
    """Two-pass (v5e) pass 1: also store the spectrogram as a bf16 intermediate.
    Min/max are taken over the bf16-rounded values so pass 2 stays inside [0, 1]."""
    nf = spec_ref.shape[-1]
    xc = jnp.dot(frames_ref[...], basis_ref[...],
                 preferred_element_type=jnp.float32)
    re = xc[:, :nf]
    im = xc[:, nf:]
    spec_bf = (re * re + im * im).astype(jnp.bfloat16)
    spec_ref[...] = spec_bf
    specq = spec_bf.astype(jnp.float32)
    g = specq.shape[0] // 8
    spec3 = specq.reshape(g, 8, nf)
    tmin_ref[...] = jnp.min(spec3, axis=0)
    tmax_ref[...] = jnp.max(spec3, axis=0)


def _normalize_tile_kernel(scale_ref, spec_ref, out_ref):
    """Two-pass (v5e) pass 2: (spec - min) * inv_range, full lane-dense width."""
    spec = spec_ref[...].astype(jnp.float32)
    out_ref[...] = (spec - scale_ref[0]) * scale_ref[1]


# --------------------------------- wrapper -----------------------------------


@functools.partial(jax.jit, static_argnames=("n_fft", "tile_r_max", "fuse_recompute"))
def spectrogram_forward(x, n_fft=512, tile_r_max=1024, fuse_recompute=None):
    """x: (B, T) float32 waveform -> (B, n_frames, n_freq) float32 in [0, 1]."""
    if fuse_recompute is None:
        # Recompute fusion wins whenever the MXU has headroom (v6e/v7x); on v5e
        # the second matmul would flip the kernel compute-bound, so keep the
        # two-pass scheme with a bf16 intermediate there.
        fuse_recompute = not _is_v5e()

    assert x.ndim == 2
    B, T = x.shape
    hop = n_fft // 2                  # torchaudio default hop = win_length // 2
    pad = n_fft // 2                  # center=True
    n_freq = n_fft // 2 + 1           # onesided
    nf_pad = _round_up(n_freq, 128)   # 257 -> 384 : lane-dense basis / output

    # ---- glue (XLA, fused under jit): reflect pad + overlapping frame gather ----
    # TODO(synk): replace this gather with in-kernel framing from the hop-chunked
    # padded waveform (manual (tile_r+1, hop) DMA per tile) for long audio.
    xp = jnp.pad(x, ((0, 0), (pad, pad)), mode="reflect")            # (B, T + n_fft)
    padded_len = T + 2 * pad
    n_frames = 1 + (padded_len - n_fft) // hop                        # = T // hop + 1
    starts = jnp.arange(n_frames) * hop
    idx = starts[:, None] + jnp.arange(n_fft)[None, :]                # (F, n_fft)
    frames2d = xp[:, idx].reshape(B * n_frames, n_fft)

    R = B * n_frames
    tile_r = tile_r_max if R >= tile_r_max else _round_up(R, 8)
    R_pad = _round_up(R, tile_r)
    num_tiles = R_pad // tile_r
    # VMEM @ tile_r=1024 (fused): frames 1MB x2 + out 1.5MB x2 + basis 0.75MB
    # resident + tiny min/max -> ~6 MB, well under the 32 MiB scoped default.

    # Pad rows by edge replication (duplicates the last real frame) so padded-tile
    # min/max equal the real-data min/max with no masking.
    frames_bf16 = jnp.pad(frames2d, ((0, R_pad - R), (0, 0)),
                          mode="edge").astype(jnp.bfloat16)

    # ---- constant [cos|sin] basis, Hann window and 1/sqrt(sum w^2) folded in ----
    n = jnp.arange(n_fft, dtype=jnp.float32)
    window = 0.5 * (1.0 - jnp.cos(2.0 * math.pi * n / n_fft))         # periodic Hann
    inv_norm = 1.0 / jnp.sqrt(jnp.sum(window * window))               # normalized=True
    k = jnp.arange(n_freq, dtype=jnp.float32)
    ang = 2.0 * math.pi * jnp.outer(n, k) / n_fft                     # (n_fft, n_freq)
    wcol = (window * inv_norm)[:, None]
    cos_m = wcol * jnp.cos(ang)
    sin_m = wcol * jnp.sin(ang)
    # Lane-pad 257 -> 384 by replicating the Nyquist column: padded spec columns
    # are exact copies of real values -> never perturb min/max.
    cos_p = jnp.pad(cos_m, ((0, 0), (0, nf_pad - n_freq)), mode="edge")
    sin_p = jnp.pad(sin_m, ((0, 0), (0, nf_pad - n_freq)), mode="edge")
    basis_bf16 = jnp.concatenate([cos_p, sin_p], axis=1).astype(jnp.bfloat16)

    frames_spec = pl.BlockSpec((tile_r, n_fft), lambda i: (i, 0))
    basis_spec = pl.BlockSpec((n_fft, 2 * nf_pad), lambda i: (0, 0))   # VMEM resident
    minmax_spec = pl.BlockSpec((8, nf_pad), lambda i: (i, 0))
    full_spec = pl.BlockSpec((tile_r, nf_pad), lambda i: (i, 0))
    smem_spec = pl.BlockSpec(memory_space=pltpu.MemorySpace.SMEM)
    cparams = pltpu.CompilerParams(dimension_semantics=("parallel",))
    minmax_shape = jax.ShapeDtypeStruct((num_tiles * 8, nf_pad), jnp.float32)

    if fuse_recompute:
        # ---- pass 1: per-tile min/max partials only (no spectrogram round-trip) --
        tmin, tmax = pl.pallas_call(
            _minmax_tile_kernel,
            out_shape=(minmax_shape, minmax_shape),
            grid=(num_tiles,),
            in_specs=[frames_spec, basis_spec],
            out_specs=(minmax_spec, minmax_spec),
            compiler_params=cparams,
        )(frames_bf16, basis_bf16)
        spec_pad = None
    else:
        # ---- pass 1: bf16 intermediate spectrogram + per-tile min/max ------------
        spec_pad, tmin, tmax = pl.pallas_call(
            _spec_store_tile_kernel,
            out_shape=(jax.ShapeDtypeStruct((R_pad, nf_pad), jnp.bfloat16),
                       minmax_shape, minmax_shape),
            grid=(num_tiles,),
            in_specs=[frames_spec, basis_spec],
            out_specs=(full_spec, minmax_spec, minmax_spec),
            compiler_params=cparams,
        )(frames_bf16, basis_bf16)

    # ---- global min/max: tiny XLA reduce over the per-tile partials --------------
    gmin = jnp.min(tmin)
    gmax = jnp.max(tmax)
    rng = gmax - gmin
    inv = jnp.where(rng > 0, 1.0 / rng, 0.0)    # degenerate (constant) input -> zeros
    scale = jnp.stack([gmin, inv]).astype(jnp.float32)               # (2,) SMEM scalars

    if fuse_recompute:
        # ---- pass 2: recompute matmul + normalize, lane-dense output -------------
        out_pad = pl.pallas_call(
            _fused_norm_kernel,
            out_shape=jax.ShapeDtypeStruct((R_pad, nf_pad), jnp.float32),
            grid=(num_tiles,),
            in_specs=[smem_spec, frames_spec, basis_spec],
            out_specs=full_spec,
            compiler_params=cparams,
        )(scale, frames_bf16, basis_bf16)
    else:
        # ---- pass 2: normalize the stored bf16 intermediate ----------------------
        out_pad = pl.pallas_call(
            _normalize_tile_kernel,
            out_shape=jax.ShapeDtypeStruct((R_pad, nf_pad), jnp.float32),
            grid=(num_tiles,),
            in_specs=[smem_spec, full_spec],
            out_specs=full_spec,
            compiler_params=cparams,
        )(scale, spec_pad)

    # Rows are batch-major (frame, freq), so this slice+reshape IS the torch
    # spectrogram.transpose(1, 2) result: (B, n_frames, n_freq).
    return out_pad[:R, :n_freq].reshape(B, n_frames, n_freq)


def _reference_forward(x, n_fft):
    """Pure-JAX f32 reference of the same forward pass (for validation)."""
    B, T = x.shape
    hop = n_fft // 2
    pad = n_fft // 2
    n_freq = n_fft // 2 + 1
    xp = jnp.pad(x, ((0, 0), (pad, pad)), mode="reflect")
    n_frames = 1 + (T + 2 * pad - n_fft) // hop
    starts = jnp.arange(n_frames) * hop
    idx = starts[:, None] + jnp.arange(n_fft)[None, :]
    frames = xp[:, idx].astype(jnp.float32)                       # (B, F, n_fft)
    n = jnp.arange(n_fft, dtype=jnp.float32)
    w = 0.5 * (1.0 - jnp.cos(2.0 * math.pi * n / n_fft))
    norm = jnp.sqrt(jnp.sum(w * w))
    k = jnp.arange(n_freq, dtype=jnp.float32)
    ang = 2.0 * math.pi * jnp.outer(n, k) / n_fft
    fw = frames * w
    re = jnp.einsum("bfn,nk->bfk", fw, jnp.cos(ang)) / norm
    im = jnp.einsum("bfn,nk->bfk", fw, jnp.sin(ang)) / norm
    p = re * re + im * im
    return (p - p.min()) / (p.max() - p.min())                    # (B, F, n_freq)


if __name__ == "__main__":
    key = jax.random.PRNGKey(0)
    # batch=2 waveforms of length 1024, n_fft=512 -> output (2, 5, 257)
    B, T, N_FFT = 2, 1024, 512
    x = jax.random.normal(key, (B, T), dtype=jnp.float32)

    n_frames = T // (N_FFT // 2) + 1
    n_freq = N_FFT // 2 + 1
    ref = _reference_forward(x, N_FFT)

    # Exercise both the chip-default path and the alternate path.
    configs = [None, bool(_is_v5e())]
    for fuse in configs:
        out = spectrogram_forward(x, n_fft=N_FFT, fuse_recompute=fuse)
        out = jax.block_until_ready(out)

        assert out.shape == (B, n_frames, n_freq), (fuse, out.shape)
        assert out.dtype == jnp.float32

        # Validate the bf16-MXU kernel against the pure-JAX f32 reference.
        max_err = float(jnp.max(jnp.abs(out - ref)))
        assert max_err < 6e-2, (fuse, max_err)

        # Global min-max normalization sanity (exact [0, 1] by construction).
        assert float(jnp.min(out)) >= -1e-6, fuse
        assert float(jnp.max(out)) <= 1.0 + 1e-5, fuse

    print("KERNEL_OK")
</pallas_src>

<mosaic_0001>
module attributes {stable_mosaic.version = 11 : i64} {
  func.func @_minmax_tile_kernel(%arg0: i32, %arg1: memref<16x512xbf16, #tpu.memory_space<vmem>>, %arg2: memref<512x768xbf16, #tpu.memory_space<vmem>>, %arg3: memref<8x384xf32, #tpu.memory_space<vmem>>, %arg4: memref<8x384xf32, #tpu.memory_space<vmem>>) attributes {dimension_semantics = [#tpu.dimension_semantics<parallel>], iteration_bounds = array<i64: 1>, scalar_prefetch = 0 : i64, scratch_operands = 0 : i64, tpu.core_type = #tpu.core_type<tc>, window_params = [{transform_indices = @transform_0, window_bounds = array<i64: 16, 512>}, {pipeline_mode = #tpu.pipeline_mode<synchronous>, transform_indices = @transform_1, window_bounds = array<i64: 512, 768>}, {transform_indices = @transform_2, window_bounds = array<i64: 8, 384>}, {transform_indices = @transform_3, window_bounds = array<i64: 8, 384>}]} {
    %c0 = arith.constant 0 : index
    %c0_0 = arith.constant 0 : index
    %0 = vector.load %arg1[%c0, %c0_0] : memref<16x512xbf16, #tpu.memory_space<vmem>>, vector<16x512xbf16>
    %c0_1 = arith.constant 0 : index
    %c0_2 = arith.constant 0 : index
    %1 = vector.load %arg2[%c0_1, %c0_2] : memref<512x768xbf16, #tpu.memory_space<vmem>>, vector<512x768xbf16>
    %cst = arith.constant dense<0.000000e+00> : vector<16x768xf32>
    %2 = tpu.matmul %0, %1, %cst {dimension_numbers = #tpu.dot_dimension_numbers<[1], [0], [0], [1], [0, 0, 1, 1], [], []>} : vector<16x512xbf16>, vector<512x768xbf16>, vector<16x768xf32> -> vector<16x768xf32>
    %3 = vector.extract_strided_slice %2 {offsets = [0, 0], sizes = [16, 384], strides = [1, 1]} : vector<16x768xf32> to vector<16x384xf32>
    %4 = vector.extract_strided_slice %2 {offsets = [0, 384], sizes = [16, 384], strides = [1, 1]} : vector<16x768xf32> to vector<16x384xf32>
    %5 = arith.mulf %3, %3 : vector<16x384xf32>
    %6 = arith.mulf %4, %4 : vector<16x384xf32>
    %7 = arith.addf %5, %6 : vector<16x384xf32>
    %8 = vector.shape_cast %7 : vector<16x384xf32> to vector<2x8x384xf32>
    %cst_3 = arith.constant dense<0x7F800000> : vector<8x384xf32>
    %9 = vector.multi_reduction <minimumf>, %8, %cst_3 [0] : vector<2x8x384xf32> to vector<8x384xf32>
    %c0_4 = arith.constant 0 : index
    %c0_5 = arith.constant 0 : index
    %10 = vector.load %arg3[%c0_4, %c0_5] : memref<8x384xf32, #tpu.memory_space<vmem>>, vector<8x384xf32>
    tpu.vector_store %arg3[%c0_4, %c0_5], %9 {strides = array<i32>} : memref<8x384xf32, #tpu.memory_space<vmem>>, vector<8x384xf32>,
    %cst_6 = arith.constant dense<0xFF800000> : vector<8x384xf32>
    %11 = vector.multi_reduction <maximumf>, %8, %cst_6 [0] : vector<2x8x384xf32> to vector<8x384xf32>
    %c0_7 = arith.constant 0 : index
    %c0_8 = arith.constant 0 : index
    %12 = vector.load %arg4[%c0_7, %c0_8] : memref<8x384xf32, #tpu.memory_space<vmem>>, vector<8x384xf32>
    tpu.vector_store %arg4[%c0_7, %c0_8], %11 {strides = array<i32>} : memref<8x384xf32, #tpu.memory_space<vmem>>, vector<8x384xf32>,
    return
  }
  func.func @transform_0(%arg0: i32) -> (i32, i32) {
    %c0_i32 = arith.constant 0 : i32
    %c0_i32_0 = arith.constant 0 : i32
    return %arg0, %c0_i32 : i32, i32
  }
  func.func @transform_1(%arg0: i32) -> (i32, i32) {
    %c0_i32 = arith.constant 0 : i32
    %c0_i32_0 = arith.constant 0 : i32
    %c0_i32_1 = arith.constant 0 : i32
    return %c0_i32, %c0_i32_0 : i32, i32
  }
  func.func @transform_2(%arg0: i32) -> (i32, i32) {
    %c0_i32 = arith.constant 0 : i32
    %c0_i32_0 = arith.constant 0 : i32
    return %arg0, %c0_i32 : i32, i32
  }
  func.func @transform_3(%arg0: i32) -> (i32, i32) {
    %c0_i32 = arith.constant 0 : i32
    %c0_i32_0 = arith.constant 0 : i32
    return %arg0, %c0_i32 : i32, i32
  }
}

module attributes {stable_mosaic.version = 11 : i64} {
  func.func @_fused_norm_kernel(%arg0: i32, %arg1: memref<2xf32, #tpu.memory_space<smem>>, %arg2: memref<16x512xbf16, #tpu.memory_space<vmem>>, %arg3: memref<512x768xbf16, #tpu.memory_space<vmem>>, %arg4: memref<16x384xf32, #tpu.memory_space<vmem>>) attributes {dimension_semantics = [#tpu.dimension_semantics<parallel>], iteration_bounds = array<i64: 1>, scalar_prefetch = 0 : i64, scratch_operands = 0 : i64, tpu.core_type = #tpu.core_type<tc>, window_params = [{transform_indices = @transform_0, window_bounds = array<i64: 2>}, {transform_indices = @transform_1, window_bounds = array<i64: 16, 512>}, {pipeline_mode = #tpu.pipeline_mode<synchronous>, transform_indices = @transform_2, window_bounds = array<i64: 512, 768>}, {transform_indices = @transform_3, window_bounds = array<i64: 16, 384>}]} {
    %c0 = arith.constant 0 : index
    %c0_0 = arith.constant 0 : index
    %0 = vector.load %arg2[%c0, %c0_0] : memref<16x512xbf16, #tpu.memory_space<vmem>>, vector<16x512xbf16>
    %c0_1 = arith.constant 0 : index
    %c0_2 = arith.constant 0 : index
    %1 = vector.load %arg3[%c0_1, %c0_2] : memref<512x768xbf16, #tpu.memory_space<vmem>>, vector<512x768xbf16>
    %cst = arith.constant dense<0.000000e+00> : vector<16x768xf32>
    %2 = tpu.matmul %0, %1, %cst {dimension_numbers = #tpu.dot_dimension_numbers<[1], [0], [0], [1], [0, 0, 1, 1], [], []>} : vector<16x512xbf16>, vector<512x768xbf16>, vector<16x768xf32> -> vector<16x768xf32>
    %3 = vector.extract_strided_slice %2 {offsets = [0, 0], sizes = [16, 384], strides = [1, 1]} : vector<16x768xf32> to vector<16x384xf32>
    %4 = vector.extract_strided_slice %2 {offsets = [0, 384], sizes = [16, 384], strides = [1, 1]} : vector<16x768xf32> to vector<16x384xf32>
    %5 = arith.mulf %3, %3 : vector<16x384xf32>
    %6 = arith.mulf %4, %4 : vector<16x384xf32>
    %7 = arith.addf %5, %6 : vector<16x384xf32>
    %c0_3 = arith.constant 0 : index
    %8 = memref.load %arg1[%c0_3] : memref<2xf32, #tpu.memory_space<smem>>
    %9 = vector.broadcast %8 : f32 to vector<16x384xf32>
    %10 = arith.subf %7, %9 : vector<16x384xf32>
    %c1 = arith.constant 1 : index
    %11 = memref.load %arg1[%c1] : memref<2xf32, #tpu.memory_space<smem>>
    %12 = vector.broadcast %11 : f32 to vector<16x384xf32>
    %13 = arith.mulf %10, %12 : vector<16x384xf32>
    %c0_4 = arith.constant 0 : index
    %c0_5 = arith.constant 0 : index
    %14 = vector.load %arg4[%c0_4, %c0_5] : memref<16x384xf32, #tpu.memory_space<vmem>>, vector<16x384xf32>
    tpu.vector_store %arg4[%c0_4, %c0_5], %13 {strides = array<i32>} : memref<16x384xf32, #tpu.memory_space<vmem>>, vector<16x384xf32>,
    return
  }
  func.func @transform_0(%arg0: i32) -> i32 {
    %c0_i32 = arith.constant 0 : i32
    %c0_i32_0 = arith.constant 0 : i32
    return %c0_i32 : i32
  }
  func.func @transform_1(%arg0: i32) -> (i32, i32) {
    %c0_i32 = arith.constant 0 : i32
    %c0_i32_0 = arith.constant 0 : i32
    return %arg0, %c0_i32 : i32, i32
  }
  func.func @transform_2(%arg0: i32) -> (i32, i32) {
    %c0_i32 = arith.constant 0 : i32
    %c0_i32_0 = arith.constant 0 : i32
    %c0_i32_1 = arith.constant 0 : i32
    return %c0_i32, %c0_i32_0 : i32, i32
  }
  func.func @transform_3(%arg0: i32) -> (i32, i32) {
    %c0_i32 = arith.constant 0 : i32
    %c0_i32_0 = arith.constant 0 : i32
    return %arg0, %c0_i32 : i32, i32
  }
}

</mosaic_0001>

<bundles_post_ra>
// kernel: spectrogram_forward.2
= control target key start
LH: loop header
LB: loop body
LE: loop exit
PB: predicated region body
PF: predicated region fallthrough
CT: control target
= control target key end

     0   :  { %s2621_s1 = inlined_call_operand.vmem [shape: bf16[512,768], index: 1, kind: input, shape index: {}]   ;;  %s2622_s0 = inlined_call_operand.vmem [shape: bf16[16,512], index: 0, kind: input, shape index: {}]   ;;  %s2623_s2 = inlined_call_operand.vmem [shape: f32[8,384], index: 2, kind: output, shape index: {0}]   ;;  %s2624_s3 = inlined_call_operand.vmem [shape: f32[8,384], index: 3, kind: output, shape index: {1}]  }
   0x1   :  { %v1681_v0 = vld [vmem:[%s2621_s1 + $0x154] ss:$24 sps:$4 sm:$0xff]   ;;  %v1685_v2 = vld [vmem:[%s2621_s1 + $0x150] ss:$24 sps:$4 sm:$0xff]   ;;  %v1687_v4 = vld [vmem:[%s2621_s1 + $0x124] ss:$24 sps:$4 sm:$0xff]  }
   0x2   :  { %v1683_v1 = vld [vmem:[%s2621_s1 + $0x454] ss:$24 sps:$4 sm:$0xff]   ;;  %1189 = vmatprep.subr.bf16.mxu0 %v1681_v0  ;;  %v1686_v3 = vld [vmem:[%s2621_s1 + $0x450] ss:$24 sps:$4 sm:$0xff]   ;;  %v1689_v5 = vld [vmem:[%s2621_s1 + $0x424] ss:$24 sps:$4 sm:$0xff]  }
   0x3   :  { %1232 = vmatprep.subr.bf16.mxu1 %v1683_v1  ;;  %1190 = vmatpush1.bf16.msra.mxu0 %v1685_v2  ;;  %v1691_v6 = vld [vmem:[%s2621_s1 + $0x120] ss:$24 sps:$4 sm:$0xff]   ;;  %v1693_v8 = vld [vmem:[%s2621_s1 + $0xf4] ss:$24 sps:$4 sm:$0xff]   ;;  %v1697_v10 = vld [vmem:[%s2621_s1 + $0xf0] ss:$24 sps:$4 sm:$0xff]  }
   0x4   :  { %1233 = vmatpush1.bf16.msra.mxu1 %v1686_v3  ;;  %1191 = vmatprep.subr.bf16.mxu0 %v1687_v4  ;;  %v1692_v7 = vld [vmem:[%s2621_s1 + $0x420] ss:$24 sps:$4 sm:$0xff]   ;;  %v1695_v9 = vld [vmem:[%s2621_s1 + $0x3f4] ss:$24 sps:$4 sm:$0xff]   ;;  %v1698_v11 = vld [vmem:[%s2621_s1 + $0x3f0] ss:$24 sps:$4 sm:$0xff]  }
   0x5   :  { %1234 = vmatprep.subr.bf16.mxu1 %v1689_v5  ;;  %v1699_v12 = vld [vmem:[%s2621_s1 + $0xc4] ss:$24 sps:$4 sm:$0xff]   ;;  %v1703_v14 = vld [vmem:[%s2621_s1 + $0xc0] ss:$24 sps:$4 sm:$0xff]   ;;  %v1705_v16 = vld [vmem:[%s2621_s1 + $0x94] ss:$24 sps:$4 sm:$0xff]  }
   0x6   :  { %v1701_v13 = vld [vmem:[%s2621_s1 + $0x3c4] ss:$24 sps:$4 sm:$0xff]   ;;  %v1704_v15 = vld [vmem:[%s2621_s1 + $0x3c0] ss:$24 sps:$4 sm:$0xff]   ;;  %v1707_v17 = vld [vmem:[%s2621_s1 + $0x394] ss:$24 sps:$4 sm:$0xff]  }
   0x7   :  { %1192 = vmatpush1.bf16.msra.mxu0 %v1691_v6  ;;  %v1709_v18 = vld [vmem:[%s2621_s1 + $0x90] ss:$24 sps:$4 sm:$0xff]   ;;  %v1711_v20 = vld [vmem:[%s2621_s1 + $0x64] ss:$24 sps:$4 sm:$0xff]   ;;  %v1715_v22 = vld [vmem:[%s2621_s1 + $0x60] ss:$24 sps:$4 sm:$0xff]  }
   0x8   :  { %1235 = vmatpush1.bf16.msra.mxu1 %v1692_v7  ;;  %1193 = vmatprep.subr.bf16.mxu0 %v1693_v8  ;;  %v1710_v19 = vld [vmem:[%s2621_s1 + $0x390] ss:$24 sps:$4 sm:$0xff]   ;;  %v1713_v21 = vld [vmem:[%s2621_s1 + $0x364] ss:$24 sps:$4 sm:$0xff]   ;;  %v1716_v23 = vld [vmem:[%s2621_s1 + $0x360] ss:$24 sps:$4 sm:$0xff]  }
   0x9   :  { %1236 = vmatprep.subr.bf16.mxu1 %v1695_v9  ;;  %v1717_v24 = vld [vmem:[%s2621_s1 + $0x34] ss:$24 sps:$4 sm:$0xff]   ;;  %v1721_v26 = vld [vmem:[%s2621_s1 + $0x30] ss:$24 sps:$4 sm:$0xff]   ;;  %v1723_v28 = vld [vmem:[%s2621_s1 + $0x4] ss:$24 sps:$4 sm:$0xff]  }
   0xa   :  { %v1719_v25 = vld [vmem:[%s2621_s1 + $0x334] ss:$24 sps:$4 sm:$0xff]   ;;  %v1722_v27 = vld [vmem:[%s2621_s1 + $0x330] ss:$24 sps:$4 sm:$0xff]   ;;  %v1725_v29 = vld [vmem:[%s2621_s1 + $0x304] ss:$24 sps:$4 sm:$0xff]  }
   0xb   :  { %1194 = vmatpush1.bf16.msra.mxu0 %v1697_v10  ;;  %v1727_v30 = vld [vmem:[%s2621_s1] ss:$24 sps:$4 sm:$0xff]   ;;  %v1729_v32 = vld [vmem:[%s2621_s1 + $0x2d4] ss:$24 sps:$4 sm:$0xff]   ;;  %v1733_v34 = vld [vmem:[%s2621_s1 + $0x2d0] ss:$24 sps:$4 sm:$0xff]  }
   0xc   :  { %1237 = vmatpush1.bf16.msra.mxu1 %v1698_v11  ;;  %1195 = vmatprep.subr.bf16.mxu0 %v1699_v12  ;;  %v1728_v31 = vld [vmem:[%s2621_s1 + $0x300] ss:$24 sps:$4 sm:$0xff]   ;;  %v1731_v33 = vld [vmem:[%s2621_s1 + $0x5d4] ss:$24 sps:$4 sm:$0xff]   ;;  %v1734_v35 = vld [vmem:[%s2621_s1 + $0x5d0] ss:$24 sps:$4 sm:$0xff]  }
   0xd   :  { %1238 = vmatprep.subr.bf16.mxu1 %v1701_v13  ;;  %v1735_v36 = vld [vmem:[%s2621_s1 + $0x2a4] ss:$24 sps:$4 sm:$0xff]   ;;  %v1739_v38 = vld [vmem:[%s2621_s1 + $0x2a0] ss:$24 sps:$4 sm:$0xff]   ;;  %v1741_v40 = vld [vmem:[%s2621_s1 + $0x274] ss:$24 sps:$4 sm:$0xff]  }
   0xe   :  { %v1737_v37 = vld [vmem:[%s2621_s1 + $0x5a4] ss:$24 sps:$4 sm:$0xff]   ;;  %v1740_v39 = vld [vmem:[%s2621_s1 + $0x5a0] ss:$24 sps:$4 sm:$0xff]   ;;  %v1743_v41 = vld [vmem:[%s2621_s1 + $0x574] ss:$24 sps:$4 sm:$0xff]  }
   0xf   :  { %1196 = vmatpush1.bf16.msra.mxu0 %v1703_v14  ;;  %v1745_v42 = vld [vmem:[%s2621_s1 + $0x270] ss:$24 sps:$4 sm:$0xff]   ;;  %v1747_v44 = vld [vmem:[%s2621_s1 + $0x244] ss:$24 sps:$4 sm:$0xff]   ;;  %v1751_v46 = vld [vmem:[%s2621_s1 + $0x240] ss:$24 sps:$4 sm:$0xff]  }
  0x10   :  { %1239 = vmatpush1.bf16.msra.mxu1 %v1704_v15  ;;  %1197 = vmatprep.subr.bf16.mxu0 %v1705_v16  ;;  %v1746_v43 = vld [vmem:[%s2621_s1 + $0x570] ss:$24 sps:$4 sm:$0xff]   ;;  %v1749_v45 = vld [vmem:[%s2621_s1 + $0x544] ss:$24 sps:$4 sm:$0xff]   ;;  %v1752_v47 = vld [vmem:[%s2621_s1 + $0x540] ss:$24 sps:$4 sm:$0xff]  }
  0x11   :  { %1240 = vmatprep.subr.bf16.mxu1 %v1707_v17  ;;  %v2142_v48 = vld [vmem:[%s2622_s0 + $0x4] ss:$16 sps:$4 sm:$0xff]   ;;  %v2150_v50 = vld [vmem:[%s2622_s0 + $0xc] ss:$16 sps:$4 sm:$0xff]   ;;  %v1757_v52 = vld [vmem:[%s2621_s1 + $0x210] ss:$24 sps:$4 sm:$0xff]  }
  0x12   :  { %v1753_v49 = vld [vmem:[%s2621_s1 + $0x214] ss:$24 sps:$4 sm:$0xff]   ;;  %1221 = vmatprep.mubr.bf16.mxu0 %v2142_v48  ;;  %1264 = vmatprep.mubr.bf16.mxu1 %v2150_v50  ;;  %v1758_v53 = vld [vmem:[%s2621_s1 + $0x510] ss:$24 sps:$4 sm:$0xff]   ;;  %v1759_v54 = vld [vmem:[%s2621_s1 + $0x1e4] ss:$24 sps:$4 sm:$0xff]  }
  0x13   :  { %1198 = vmatpush1.bf16.msra.mxu0 %v1709_v18  ;;  %v1755_v51 = vld [vmem:[%s2621_s1 + $0x514] ss:$24 sps:$4 sm:$0xff]   ;;  %v1761_v55 = vld [vmem:[%s2621_s1 + $0x4e4] ss:$24 sps:$4 sm:$0xff]   ;;  %v1763_v56 = vld [vmem:[%s2621_s1 + $0x1e0] ss:$24 sps:$4 sm:$0xff]  }
  0x14   :  { %1241 = vmatpush1.bf16.msra.mxu1 %v1710_v19  ;;  %1199 = vmatprep.subr.bf16.mxu0 %v1711_v20  ;;  %v1764_v57 = vld [vmem:[%s2621_s1 + $0x4e0] ss:$24 sps:$4 sm:$0xff]   ;;  %v1765_v58 = vld [vmem:[%s2621_s1 + $0x1b4] ss:$24 sps:$4 sm:$0xff]   ;;  %v1769_v60 = vld [vmem:[%s2621_s1 + $0x1b0] ss:$24 sps:$4 sm:$0xff]  }
  0x15   :  { %1242 = vmatprep.subr.bf16.mxu1 %v1713_v21  ;;  %v1767_v59 = vld [vmem:[%s2621_s1 + $0x4b4] ss:$24 sps:$4 sm:$0xff]   ;;  %v1770_v61 = vld [vmem:[%s2621_s1 + $0x4b0] ss:$24 sps:$4 sm:$0xff]   ;;  %v1771_v62 = vld [vmem:[%s2621_s1 + $0x184] ss:$24 sps:$4 sm:$0xff]  }
  0x16   :  { %v1773_v63 = vld [vmem:[%s2621_s1 + $0x484] ss:$24 sps:$4 sm:$0xff]   ;;  %v1775_v0 = vld [vmem:[%s2621_s1 + $0x180] ss:$24 sps:$4 sm:$0xff]  }
  0x17   :  { %1200 = vmatpush1.bf16.msra.mxu0 %v1715_v22  ;;  %v1776_v1 = vld [vmem:[%s2621_s1 + $0x480] ss:$24 sps:$4 sm:$0xff]   ;;  %v1785_v2 = vld [vmem:[%s2621_s1 + $0x15c] ss:$24 sps:$4 sm:$0xff]   ;;  %v1791_v8 = vld [vmem:[%s2621_s1 + $0x12c] ss:$24 sps:$4 sm:$0xff]  }
  0x18   :  { %1243 = vmatpush1.bf16.msra.mxu1 %v1716_v23  ;;  %1201 = vmatprep.subr.bf16.mxu0 %v1717_v24  ;;  %v1788_v3 = vld [vmem:[%s2621_s1 + $0x45c] ss:$24 sps:$4 sm:$0xff]   ;;  %v2208_v4 = vld [vmem:[%s2622_s0] ss:$16 sps:$4 sm:$0xff]   ;;  %v2213_v5 = vld [vmem:[%s2622_s0 + $0x8] ss:$16 sps:$4 sm:$0xff]  }
  0x19   :  { %1244 = vmatprep.subr.bf16.mxu1 %v1719_v25  ;;  %v1783_v6 = vld [vmem:[%s2621_s1 + $0x158] ss:$24 sps:$4 sm:$0xff]   ;;  %v1794_v9 = vld [vmem:[%s2621_s1 + $0x42c] ss:$24 sps:$4 sm:$0xff]   ;;  %v1789_v10 = vld [vmem:[%s2621_s1 + $0x128] ss:$24 sps:$4 sm:$0xff]  }
  0x1a   :  { %v1786_v7 = vld [vmem:[%s2621_s1 + $0x458] ss:$24 sps:$4 sm:$0xff]   ;;  %v1792_v11 = vld [vmem:[%s2621_s1 + $0x428] ss:$24 sps:$4 sm:$0xff]   ;;  %v1797_v12 = vld [vmem:[%s2621_s1 + $0xfc] ss:$24 sps:$4 sm:$0xff]  }
  0x1b   :  { %1202 = vmatpush1.bf16.msra.mxu0 %v1721_v26  ;;  %v1800_v13 = vld [vmem:[%s2621_s1 + $0x3fc] ss:$24 sps:$4 sm:$0xff]   ;;  %v1795_v14 = vld [vmem:[%s2621_s1 + $0xf8] ss:$24 sps:$4 sm:$0xff]   ;;  %v1803_v16 = vld [vmem:[%s2621_s1 + $0xcc] ss:$24 sps:$4 sm:$0xff]  }
  0x1c   :  { %1245 = vmatpush1.bf16.msra.mxu1 %v1722_v27  ;;  %1203 = vmatprep.subr.bf16.mxu0 %v1723_v28  ;;  %v1798_v15 = vld [vmem:[%s2621_s1 + $0x3f8] ss:$24 sps:$4 sm:$0xff]   ;;  %v1806_v17 = vld [vmem:[%s2621_s1 + $0x3cc] ss:$24 sps:$4 sm:$0xff]   ;;  %v1801_v18 = vld [vmem:[%s2621_s1 + $0xc8] ss:$24 sps:$4 sm:$0xff]  }
  0x1d   :  { %1246 = vmatprep.subr.bf16.mxu1 %v1725_v29  ;;  %v1804_v19 = vld [vmem:[%s2621_s1 + $0x3c8] ss:$24 sps:$4 sm:$0xff]   ;;  %v1809_v20 = vld [vmem:[%s2621_s1 + $0x9c] ss:$24 sps:$4 sm:$0xff]   ;;  %v1807_v22 = vld [vmem:[%s2621_s1 + $0x98] ss:$24 sps:$4 sm:$0xff]  }
  0x1e   :  { %v1812_v21 = vld [vmem:[%s2621_s1 + $0x39c] ss:$24 sps:$4 sm:$0xff]   ;;  %v1810_v23 = vld [vmem:[%s2621_s1 + $0x398] ss:$24 sps:$4 sm:$0xff]   ;;  %v1815_v24 = vld [vmem:[%s2621_s1 + $0x6c] ss:$24 sps:$4 sm:$0xff]  }
  0x1f   :  { %1204 = vmatpush1.bf16.msra.mxu0 %v1727_v30  ;;  %v1818_v25 = vld [vmem:[%s2621_s1 + $0x36c] ss:$24 sps:$4 sm:$0xff]   ;;  %v1813_v26 = vld [vmem:[%s2621_s1 + $0x68] ss:$24 sps:$4 sm:$0xff]   ;;  %v1821_v28 = vld [vmem:[%s2621_s1 + $0x3c] ss:$24 sps:$4 sm:$0xff]  }
  0x20   :  { %1247 = vmatpush1.bf16.msra.mxu1 %v1728_v31  ;;  %1205 = vmatprep.subr.bf16.mxu0 %v1729_v32  ;;  %v1816_v27 = vld [vmem:[%s2621_s1 + $0x368] ss:$24 sps:$4 sm:$0xff]   ;;  %v1824_v29 = vld [vmem:[%s2621_s1 + $0x33c] ss:$24 sps:$4 sm:$0xff]   ;;  %v1819_v30 = vld [vmem:[%s2621_s1 + $0x38] ss:$24 sps:$4 sm:$0xff]  }
  0x21   :  { %1248 = vmatprep.subr.bf16.mxu1 %v1731_v33  ;;  %v1822_v31 = vld [vmem:[%s2621_s1 + $0x338] ss:$24 sps:$4 sm:$0xff]   ;;  %v1827_v32 = vld [vmem:[%s2621_s1 + $0xc] ss:$24 sps:$4 sm:$0xff]  }
  0x22   :  { %v1830_v33 = vld [vmem:[%s2621_s1 + $0x30c] ss:$24 sps:$4 sm:$0xff]  }
  0x23   :  { %1206 = vmatpush2.bf16.msra.mxu0 %v1733_v34  ;;  %v1825_v34 = vld [vmem:[%s2621_s1 + $0x8] ss:$24 sps:$4 sm:$0xff]  }
  0x24   :  { %1249 = vmatpush2.bf16.msra.mxu1 %v1734_v35  ;;  %1207 = vmatprep.subr.bf16.mxu0 %v1735_v36  ;;  %v1828_v35 = vld [vmem:[%s2621_s1 + $0x308] ss:$24 sps:$4 sm:$0xff]   ;;  %v1833_v36 = vld [vmem:[%s2621_s1 + $0x2dc] ss:$24 sps:$4 sm:$0xff]  }
  0x25   :  { %1250 = vmatprep.subr.bf16.mxu1 %v1737_v37  ;;  %v1836_v37 = vld [vmem:[%s2621_s1 + $0x5dc] ss:$24 sps:$4 sm:$0xff]  }
  0x27   :  { %1208 = vmatpush2.bf16.msra.mxu0 %v1739_v38  ;;  %v1831_v38 = vld [vmem:[%s2621_s1 + $0x2d8] ss:$24 sps:$4 sm:$0xff]  }
  0x28   :  { %1251 = vmatpush2.bf16.msra.mxu1 %v1740_v39  ;;  %1209 = vmatprep.subr.bf16.mxu0 %v1741_v40  ;;  %v1834_v39 = vld [vmem:[%s2621_s1 + $0x5d8] ss:$24 sps:$4 sm:$0xff]   ;;  %v1839_v40 = vld [vmem:[%s2621_s1 + $0x2ac] ss:$24 sps:$4 sm:$0xff]  }
  0x29   :  { %1252 = vmatprep.subr.bf16.mxu1 %v1743_v41  ;;  %v1842_v41 = vld [vmem:[%s2621_s1 + $0x5ac] ss:$24 sps:$4 sm:$0xff]  }
  0x2b   :  { %1210 = vmatpush2.bf16.msra.mxu0 %v1745_v42  ;;  %v1837_v42 = vld [vmem:[%s2621_s1 + $0x2a8] ss:$24 sps:$4 sm:$0xff]  }
  0x2c   :  { %1253 = vmatpush2.bf16.msra.mxu1 %v1746_v43  ;;  %1211 = vmatprep.subr.bf16.mxu0 %v1747_v44  ;;  %v1840_v43 = vld [vmem:[%s2621_s1 + $0x5a8] ss:$24 sps:$4 sm:$0xff]   ;;  %v1845_v44 = vld [vmem:[%s2621_s1 + $0x27c] ss:$24 sps:$4 sm:$0xff]  }
  0x2d   :  { %1254 = vmatprep.subr.bf16.mxu1 %v1749_v45  ;;  %v1848_v45 = vld [vmem:[%s2621_s1 + $0x57c] ss:$24 sps:$4 sm:$0xff]  }
  0x2f   :  { %1212 = vmatpush2.bf16.msra.mxu0 %v1751_v46  ;;  %v1843_v46 = vld [vmem:[%s2621_s1 + $0x278] ss:$24 sps:$4 sm:$0xff]  }
  0x30   :  { %1255 = vmatpush2.bf16.msra.mxu1 %v1752_v47  ;;  %1213 = vmatprep.subr.bf16.mxu0 %v1753_v49  ;;  %v1846_v47 = vld [vmem:[%s2621_s1 + $0x578] ss:$24 sps:$4 sm:$0xff]   ;;  %v1851_v49 = vld [vmem:[%s2621_s1 + $0x24c] ss:$24 sps:$4 sm:$0xff]  }
  0x31   :  { %1256 = vmatprep.subr.bf16.mxu1 %v1755_v51  ;;  %v1854_v51 = vld [vmem:[%s2621_s1 + $0x54c] ss:$24 sps:$4 sm:$0xff]  }
  0x33   :  { %1214 = vmatpush2.bf16.msra.mxu0 %v1757_v52  ;;  %v1849_v52 = vld [vmem:[%s2621_s1 + $0x248] ss:$24 sps:$4 sm:$0xff]  }
  0x34   :  { %1257 = vmatpush2.bf16.msra.mxu1 %v1758_v53  ;;  %1215 = vmatprep.subr.bf16.mxu0 %v1759_v54  ;;  %v1852_v53 = vld [vmem:[%s2621_s1 + $0x548] ss:$24 sps:$4 sm:$0xff]   ;;  %v1857_v54 = vld [vmem:[%s2621_s1 + $0x21c] ss:$24 sps:$4 sm:$0xff]  }
  0x35   :  { %1258 = vmatprep.subr.bf16.mxu1 %v1761_v55  ;;  %v1860_v55 = vld [vmem:[%s2621_s1 + $0x51c] ss:$24 sps:$4 sm:$0xff]  }
  0x37   :  { %1216 = vmatpush2.bf16.msra.mxu0 %v1763_v56  ;;  %v1855_v56 = vld [vmem:[%s2621_s1 + $0x218] ss:$24 sps:$4 sm:$0xff]  }
  0x38   :  { %1259 = vmatpush2.bf16.msra.mxu1 %v1764_v57  ;;  %1217 = vmatprep.subr.bf16.mxu0 %v1765_v58  ;;  %v1858_v57 = vld [vmem:[%s2621_s1 + $0x518] ss:$24 sps:$4 sm:$0xff]   ;;  %v1863_v58 = vld [vmem:[%s2621_s1 + $0x1ec] ss:$24 sps:$4 sm:$0xff]  }
  0x39   :  { %1260 = vmatprep.subr.bf16.mxu1 %v1767_v59  ;;  %v1866_v59 = vld [vmem:[%s2621_s1 + $0x4ec] ss:$24 sps:$4 sm:$0xff]  }
  0x3b   :  { %1218 = vmatpush2.bf16.msra.mxu0 %v1769_v60  ;;  %v1861_v60 = vld [vmem:[%s2621_s1 + $0x1e8] ss:$24 sps:$4 sm:$0xff]  }
  0x3c   :  { %1261 = vmatpush2.bf16.msra.mxu1 %v1770_v61  ;;  %1219 = vmatprep.subr.bf16.mxu0 %v1771_v62  ;;  %v1864_v61 = vld [vmem:[%s2621_s1 + $0x4e8] ss:$24 sps:$4 sm:$0xff]   ;;  %v1869_v62 = vld [vmem:[%s2621_s1 + $0x1bc] ss:$24 sps:$4 sm:$0xff]  }
  0x3d   :  { %1262 = vmatprep.subr.bf16.mxu1 %v1773_v63  ;;  %v1872_v63 = vld [vmem:[%s2621_s1 + $0x4bc] ss:$24 sps:$4 sm:$0xff]  }
  0x3f   :  { %1220 = vmatpush2.bf16.msra.mxu0 %v1775_v0  ;;  %v1867_v0 = vld [vmem:[%s2621_s1 + $0x1b8] ss:$24 sps:$4 sm:$0xff]  }
  0x40   :  { %1263 = vmatpush2.bf16.msra.mxu1 %v1776_v1  ;;  %1275 = vmatprep.subr.bf16.mxu0 %v1785_v2  ;;  %v1870_v1 = vld [vmem:[%s2621_s1 + $0x4b8] ss:$24 sps:$4 sm:$0xff]   ;;  %v1875_v2 = vld [vmem:[%s2621_s1 + $0x18c] ss:$24 sps:$4 sm:$0xff]  }
  0x41   :  { %1318 = vmatprep.subr.bf16.mxu1 %v1788_v3  ;;  %v1878_v3 = vld [vmem:[%s2621_s1 + $0x48c] ss:$24 sps:$4 sm:$0xff]  }
  0x42   :  { %1222 = vmatmul.mubr.bf16.vlgmr.msra.gmra.mxu0 %v2208_v4 }
  0x43   :  { %1265 = vmatmul.mubr.bf16.vlgmr.msra.gmra.mxu1 %v2213_v5  ;;  %1276 = vmatpush1.bf16.msra.mxu0 %v1783_v6  ;;  %v1873_v6 = vld [vmem:[%s2621_s1 + $0x188] ss:$24 sps:$4 sm:$0xff]  }
  0x44   :  { %1319 = vmatpush1.bf16.msra.mxu1 %v1786_v7  ;;  %1277 = vmatprep.subr.bf16.mxu0 %v1791_v8  ;;  %v1876_v7 = vld [vmem:[%s2621_s1 + $0x488] ss:$24 sps:$4 sm:$0xff]   ;;  %v1881_v8 = vld [vmem:[%s2621_s1 + $0x164] ss:$24 sps:$4 sm:$0xff]  }
  0x45   :  { %1320 = vmatprep.subr.bf16.mxu1 %v1794_v9  ;;  %1307 = vmatprep.mubr.bf16.mxu0 %v2142_v48  ;;  %v1884_v9 = vld [vmem:[%s2621_s1 + $0x464] ss:$24 sps:$4 sm:$0xff]  }
  0x46   :  { %1350 = vmatprep.mubr.bf16.mxu1 %v2150_v50 }
  0x47   :  { %1278 = vmatpush1.bf16.msra.mxu0 %v1789_v10  ;;  %v1879_v10 = vld [vmem:[%s2621_s1 + $0x160] ss:$24 sps:$4 sm:$0xff]  }
  0x48   :  { %1321 = vmatpush1.bf16.msra.mxu1 %v1792_v11  ;;  %1279 = vmatprep.subr.bf16.mxu0 %v1797_v12  ;;  %v1882_v11 = vld [vmem:[%s2621_s1 + $0x460] ss:$24 sps:$4 sm:$0xff]   ;;  %v1887_v12 = vld [vmem:[%s2621_s1 + $0x134] ss:$24 sps:$4 sm:$0xff]  }
  0x49   :  { %1322 = vmatprep.subr.bf16.mxu1 %v1800_v13  ;;  %v1890_v13 = vld [vmem:[%s2621_s1 + $0x434] ss:$24 sps:$4 sm:$0xff]  }
  0x4b   :  { %1280 = vmatpush1.bf16.msra.mxu0 %v1795_v14  ;;  %v1885_v14 = vld [vmem:[%s2621_s1 + $0x130] ss:$24 sps:$4 sm:$0xff]  }
  0x4c   :  { %1323 = vmatpush1.bf16.msra.mxu1 %v1798_v15  ;;  %1281 = vmatprep.subr.bf16.mxu0 %v1803_v16  ;;  %v1888_v15 = vld [vmem:[%s2621_s1 + $0x430] ss:$24 sps:$4 sm:$0xff]   ;;  %v1893_v16 = vld [vmem:[%s2621_s1 + $0x104] ss:$24 sps:$4 sm:$0xff]  }
  0x4d   :  { %1324 = vmatprep.subr.bf16.mxu1 %v1806_v17  ;;  %v1896_v17 = vld [vmem:[%s2621_s1 + $0x404] ss:$24 sps:$4 sm:$0xff]  }
  0x4f   :  { %1282 = vmatpush1.bf16.msra.mxu0 %v1801_v18  ;;  %v1891_v18 = vld [vmem:[%s2621_s1 + $0x100] ss:$24 sps:$4 sm:$0xff]  }
  0x50   :  { %1325 = vmatpush1.bf16.msra.mxu1 %v1804_v19  ;;  %1283 = vmatprep.subr.bf16.mxu0 %v1809_v20  ;;  %v1894_v19 = vld [vmem:[%s2621_s1 + $0x400] ss:$24 sps:$4 sm:$0xff]   ;;  %v1899_v20 = vld [vmem:[%s2621_s1 + $0xd4] ss:$24 sps:$4 sm:$0xff]  }
  0x51   :  { %1326 = vmatprep.subr.bf16.mxu1 %v1812_v21  ;;  %v1900_v21 = vld [vmem:[%s2621_s1 + $0x3d0] ss:$24 sps:$4 sm:$0xff]  }
  0x53   :  { %1284 = vmatpush1.bf16.msra.mxu0 %v1807_v22  ;;  %v1905_v22 = vld [vmem:[%s2621_s1 + $0xa4] ss:$24 sps:$4 sm:$0xff]  }
  0x54   :  { %1327 = vmatpush1.bf16.msra.mxu1 %v1810_v23  ;;  %1285 = vmatprep.subr.bf16.mxu0 %v1815_v24  ;;  %v1908_v23 = vld [vmem:[%s2621_s1 + $0x3a4] ss:$24 sps:$4 sm:$0xff]   ;;  %v1903_v24 = vld [vmem:[%s2621_s1 + $0xa0] ss:$24 sps:$4 sm:$0xff]  }
  0x55   :  { %1328 = vmatprep.subr.bf16.mxu1 %v1818_v25  ;;  %v1906_v25 = vld [vmem:[%s2621_s1 + $0x3a0] ss:$24 sps:$4 sm:$0xff]  }
  0x57   :  { %1286 = vmatpush1.bf16.msra.mxu0 %v1813_v26  ;;  %v1911_v26 = vld [vmem:[%s2621_s1 + $0x74] ss:$24 sps:$4 sm:$0xff]  }
  0x58   :  { %1329 = vmatpush1.bf16.msra.mxu1 %v1816_v27  ;;  %1287 = vmatprep.subr.bf16.mxu0 %v1821_v28  ;;  %v1914_v27 = vld [vmem:[%s2621_s1 + $0x374] ss:$24 sps:$4 sm:$0xff]   ;;  %v1909_v28 = vld [vmem:[%s2621_s1 + $0x70] ss:$24 sps:$4 sm:$0xff]  }
  0x59   :  { %1330 = vmatprep.subr.bf16.mxu1 %v1824_v29  ;;  %v1912_v29 = vld [vmem:[%s2621_s1 + $0x370] ss:$24 sps:$4 sm:$0xff]  }
  0x5b   :  { %1288 = vmatpush1.bf16.msra.mxu0 %v1819_v30  ;;  %v1917_v30 = vld [vmem:[%s2621_s1 + $0x44] ss:$24 sps:$4 sm:$0xff]  }
  0x5c   :  { %1331 = vmatpush1.bf16.msra.mxu1 %v1822_v31  ;;  %1289 = vmatprep.subr.bf16.mxu0 %v1827_v32  ;;  %v1920_v31 = vld [vmem:[%s2621_s1 + $0x344] ss:$24 sps:$4 sm:$0xff]   ;;  %v1915_v32 = vld [vmem:[%s2621_s1 + $0x40] ss:$24 sps:$4 sm:$0xff]  }
  0x5d   :  { %1332 = vmatprep.subr.bf16.mxu1 %v1830_v33  ;;  %v1918_v33 = vld [vmem:[%s2621_s1 + $0x340] ss:$24 sps:$4 sm:$0xff]  }
  0x5f   :  { %1290 = vmatpush1.bf16.msra.mxu0 %v1825_v34  ;;  %v1923_v34 = vld [vmem:[%s2621_s1 + $0x14] ss:$24 sps:$4 sm:$0xff]  }
  0x60   :  { %1333 = vmatpush1.bf16.msra.mxu1 %v1828_v35  ;;  %1291 = vmatprep.subr.bf16.mxu0 %v1833_v36  ;;  %v1926_v35 = vld [vmem:[%s2621_s1 + $0x314] ss:$24 sps:$4 sm:$0xff]   ;;  %v1921_v36 = vld [vmem:[%s2621_s1 + $0x10] ss:$24 sps:$4 sm:$0xff]  }
  0x61   :  { %1334 = vmatprep.subr.bf16.mxu1 %v1836_v37  ;;  %v1924_v37 = vld [vmem:[%s2621_s1 + $0x310] ss:$24 sps:$4 sm:$0xff]  }
  0x63   :  { %1292 = vmatpush2.bf16.msra.mxu0 %v1831_v38  ;;  %v1929_v38 = vld [vmem:[%s2621_s1 + $0x2e4] ss:$24 sps:$4 sm:$0xff]  }
  0x64   :  { %1335 = vmatpush2.bf16.msra.mxu1 %v1834_v39  ;;  %1293 = vmatprep.subr.bf16.mxu0 %v1839_v40  ;;  %v1932_v39 = vld [vmem:[%s2621_s1 + $0x5e4] ss:$24 sps:$4 sm:$0xff]   ;;  %v1927_v40 = vld [vmem:[%s2621_s1 + $0x2e0] ss:$24 sps:$4 sm:$0xff]  }
  0x65   :  { %1336 = vmatprep.subr.bf16.mxu1 %v1842_v41  ;;  %v1930_v41 = vld [vmem:[%s2621_s1 + $0x5e0] ss:$24 sps:$4 sm:$0xff]  }
  0x67   :  { %1294 = vmatpush2.bf16.msra.mxu0 %v1837_v42  ;;  %v1935_v42 = vld [vmem:[%s2621_s1 + $0x2b4] ss:$24 sps:$4 sm:$0xff]  }
  0x68   :  { %1337 = vmatpush2.bf16.msra.mxu1 %v1840_v43  ;;  %1295 = vmatprep.subr.bf16.mxu0 %v1845_v44  ;;  %v1938_v43 = vld [vmem:[%s2621_s1 + $0x5b4] ss:$24 sps:$4 sm:$0xff]   ;;  %v1933_v44 = vld [vmem:[%s2621_s1 + $0x2b0] ss:$24 sps:$4 sm:$0xff]  }
  0x69   :  { %1338 = vmatprep.subr.bf16.mxu1 %v1848_v45  ;;  %v1936_v45 = vld [vmem:[%s2621_s1 + $0x5b0] ss:$24 sps:$4 sm:$0xff]  }
  0x6b   :  { %1296 = vmatpush2.bf16.msra.mxu0 %v1843_v46  ;;  %v1941_v46 = vld [vmem:[%s2621_s1 + $0x284] ss:$24 sps:$4 sm:$0xff]  }
  0x6c   :  { %1339 = vmatpush2.bf16.msra.mxu1 %v1846_v47  ;;  %1297 = vmatprep.subr.bf16.mxu0 %v1851_v49  ;;  %v1944_v47 = vld [vmem:[%s2621_s1 + $0x584] ss:$24 sps:$4 sm:$0xff]   ;;  %v1939_v49 = vld [vmem:[%s2621_s1 + $0x280] ss:$24 sps:$4 sm:$0xff]  }
  0x6d   :  { %1340 = vmatprep.subr.bf16.mxu1 %v1854_v51  ;;  %v1942_v51 = vld [vmem:[%s2621_s1 + $0x580] ss:$24 sps:$4 sm:$0xff]  }
  0x6f   :  { %1298 = vmatpush2.bf16.msra.mxu0 %v1849_v52  ;;  %v1947_v52 = vld [vmem:[%s2621_s1 + $0x254] ss:$24 sps:$4 sm:$0xff]  }
  0x70   :  { %1341 = vmatpush2.bf16.msra.mxu1 %v1852_v53  ;;  %1299 = vmatprep.subr.bf16.mxu0 %v1857_v54  ;;  %v1950_v53 = vld [vmem:[%s2621_s1 + $0x554] ss:$24 sps:$4 sm:$0xff]   ;;  %v1945_v54 = vld [vmem:[%s2621_s1 + $0x250] ss:$24 sps:$4 sm:$0xff]  }
  0x71   :  { %1342 = vmatprep.subr.bf16.mxu1 %v1860_v55  ;;  %v1948_v55 = vld [vmem:[%s2621_s1 + $0x550] ss:$24 sps:$4 sm:$0xff]  }
  0x73   :  { %1300 = vmatpush2.bf16.msra.mxu0 %v1855_v56  ;;  %v1953_v56 = vld [vmem:[%s2621_s1 + $0x224] ss:$24 sps:$4 sm:$0xff]  }
  0x74   :  { %1343 = vmatpush2.bf16.msra.mxu1 %v1858_v57  ;;  %1301 = vmatprep.subr.bf16.mxu0 %v1863_v58  ;;  %v1956_v57 = vld [vmem:[%s2621_s1 + $0x524] ss:$24 sps:$4 sm:$0xff]   ;;  %v1951_v58 = vld [vmem:[%s2621_s1 + $0x220] ss:$24 sps:$4 sm:$0xff]  }
  0x75   :  { %1344 = vmatprep.subr.bf16.mxu1 %v1866_v59  ;;  %v1954_v59 = vld [vmem:[%s2621_s1 + $0x520] ss:$24 sps:$4 sm:$0xff]  }
  0x77   :  { %1302 = vmatpush2.bf16.msra.mxu0 %v1861_v60  ;;  %v1959_v60 = vld [vmem:[%s2621_s1 + $0x1f4] ss:$24 sps:$4 sm:$0xff]  }
  0x78   :  { %1345 = vmatpush2.bf16.msra.mxu1 %v1864_v61  ;;  %1303 = vmatprep.subr.bf16.mxu0 %v1869_v62  ;;  %v1962_v61 = vld [vmem:[%s2621_s1 + $0x4f4] ss:$24 sps:$4 sm:$0xff]   ;;  %v1957_v62 = vld [vmem:[%s2621_s1 + $0x1f0] ss:$24 sps:$4 sm:$0xff]  }
  0x79   :  { %1346 = vmatprep.subr.bf16.mxu1 %v1872_v63  ;;  %v1960_v63 = vld [vmem:[%s2621_s1 + $0x4f0] ss:$24 sps:$4 sm:$0xff]  }
  0x7b   :  { %1304 = vmatpush2.bf16.msra.mxu0 %v1867_v0  ;;  %v1965_v0 = vld [vmem:[%s2621_s1 + $0x1c4] ss:$24 sps:$4 sm:$0xff]  }
  0x7c   :  { %1347 = vmatpush2.bf16.msra.mxu1 %v1870_v1  ;;  %1305 = vmatprep.subr.bf16.mxu0 %v1875_v2  ;;  %v1968_v1 = vld [vmem:[%s2621_s1 + $0x4c4] ss:$24 sps:$4 sm:$0xff]   ;;  %v1963_v2 = vld [vmem:[%s2621_s1 + $0x1c0] ss:$24 sps:$4 sm:$0xff]  }
  0x7d   :  { %1348 = vmatprep.subr.bf16.mxu1 %v1878_v3  ;;  %v1966_v3 = vld [vmem:[%s2621_s1 + $0x4c0] ss:$24 sps:$4 sm:$0xff]  }
  0x7f   :  { %1306 = vmatpush2.bf16.msra.mxu0 %v1873_v6  ;;  %v1971_v6 = vld [vmem:[%s2621_s1 + $0x194] ss:$24 sps:$4 sm:$0xff]  }
  0x80   :  { %1349 = vmatpush2.bf16.msra.mxu1 %v1876_v7  ;;  %1361 = vmatprep.subr.bf16.mxu0 %v1881_v8  ;;  %v1974_v7 = vld [vmem:[%s2621_s1 + $0x494] ss:$24 sps:$4 sm:$0xff]   ;;  %v1969_v8 = vld [vmem:[%s2621_s1 + $0x190] ss:$24 sps:$4 sm:$0xff]  }
  0x81   :  { %1404 = vmatprep.subr.bf16.mxu1 %v1884_v9  ;;  %v1972_v9 = vld [vmem:[%s2621_s1 + $0x490] ss:$24 sps:$4 sm:$0xff]  }
  0x82   :  { %1308 = vmatmul.mubr.bf16.vlgmr.msra.gmra.mxu0 %v2208_v4 }
  0x83   :  { %1351 = vmatmul.mubr.bf16.vlgmr.msra.gmra.mxu1 %v2213_v5  ;;  %1362 = vmatpush1.bf16.msra.mxu0 %v1879_v10 }
  0x84   :  { %1405 = vmatpush1.bf16.msra.mxu1 %v1882_v11  ;;  %1363 = vmatprep.subr.bf16.mxu0 %v1887_v12 }
  0x85   :  { %1406 = vmatprep.subr.bf16.mxu1 %v1890_v13  ;;  %1393 = vmatprep.mubr.bf16.mxu0 %v2142_v48  ;;  %v1902_v48 = vld [vmem:[%s2621_s1 + $0x3d4] ss:$24 sps:$4 sm:$0xff]  }
  0x86   :  { %1436 = vmatprep.mubr.bf16.mxu1 %v2150_v50  ;;  %v1897_v50 = vld [vmem:[%s2621_s1 + $0xd0] ss:$24 sps:$4 sm:$0xff]  }
  0x87   :  { %1364 = vmatpush1.bf16.msra.mxu0 %v1885_v14 }
  0x88   :  { %1407 = vmatpush1.bf16.msra.mxu1 %v1888_v15  ;;  %1365 = vmatprep.subr.bf16.mxu0 %v1893_v16 }
  0x89   :  { %1408 = vmatprep.subr.bf16.mxu1 %v1896_v17 }
  0x8b   :  { %1366 = vmatpush1.bf16.msra.mxu0 %v1891_v18 }
  0x8c   :  { %1409 = vmatpush1.bf16.msra.mxu1 %v1894_v19  ;;  %1367 = vmatprep.subr.bf16.mxu0 %v1899_v20 }
  0x8d   :  { %1410 = vmatprep.subr.bf16.mxu1 %v1902_v48 }
  0x8f   :  { %1368 = vmatpush1.bf16.msra.mxu0 %v1897_v50 }
  0x90   :  { %1411 = vmatpush1.bf16.msra.mxu1 %v1900_v21  ;;  %1369 = vmatprep.subr.bf16.mxu0 %v1905_v22 }
  0x91   :  { %1412 = vmatprep.subr.bf16.mxu1 %v1908_v23 }
  0x93   :  { %1370 = vmatpush1.bf16.msra.mxu0 %v1903_v24 }
  0x94   :  { %1413 = vmatpush1.bf16.msra.mxu1 %v1906_v25  ;;  %1371 = vmatprep.subr.bf16.mxu0 %v1911_v26 }
  0x95   :  { %1414 = vmatprep.subr.bf16.mxu1 %v1914_v27 }
  0x97   :  { %1372 = vmatpush1.bf16.msra.mxu0 %v1909_v28 }
  0x98   :  { %1415 = vmatpush1.bf16.msra.mxu1 %v1912_v29  ;;  %1373 = vmatprep.subr.bf16.mxu0 %v1917_v30 }
  0x99   :  { %1416 = vmatprep.subr.bf16.mxu1 %v1920_v31 }
  0x9b   :  { %1374 = vmatpush1.bf16.msra.mxu0 %v1915_v32 }
  0x9c   :  { %1417 = vmatpush1.bf16.msra.mxu1 %v1918_v33  ;;  %1375 = vmatprep.subr.bf16.mxu0 %v1923_v34 }
  0x9d   :  { %1418 = vmatprep.subr.bf16.mxu1 %v1926_v35 }
  0x9f   :  { %1376 = vmatpush1.bf16.msra.mxu0 %v1921_v36 }
  0xa0   :  { %1419 = vmatpush1.bf16.msra.mxu1 %v1924_v37  ;;  %1377 = vmatprep.subr.bf16.mxu0 %v1929_v38 }
  0xa1   :  { %1420 = vmatprep.subr.bf16.mxu1 %v1932_v39 }
  0xa3   :  { %1378 = vmatpush2.bf16.msra.mxu0 %v1927_v40 }
  0xa4   :  { %1421 = vmatpush2.bf16.msra.mxu1 %v1930_v41  ;;  %1379 = vmatprep.subr.bf16.mxu0 %v1935_v42 }
  0xa5   :  { %1422 = vmatprep.subr.bf16.mxu1 %v1938_v43 }
  0xa7   :  { %1380 = vmatpush2.bf16.msra.mxu0 %v1933_v44 }
  0xa8   :  { %1423 = vmatpush2.bf16.msra.mxu1 %v1936_v45  ;;  %1381 = vmatprep.subr.bf16.mxu0 %v1941_v46 }
  0xa9   :  { %1424 = vmatprep.subr.bf16.mxu1 %v1944_v47 }
  0xab   :  { %1382 = vmatpush2.bf16.msra.mxu0 %v1939_v49 }
  0xac   :  { %1425 = vmatpush2.bf16.msra.mxu1 %v1942_v51  ;;  %1383 = vmatprep.subr.bf16.mxu0 %v1947_v52 }
  0xad   :  { %1426 = vmatprep.subr.bf16.mxu1 %v1950_v53 }
  0xaf   :  { %1384 = vmatpush2.bf16.msra.mxu0 %v1945_v54 }
  0xb0   :  { %1427 = vmatpush2.bf16.msra.mxu1 %v1948_v55  ;;  %1385 = vmatprep.subr.bf16.mxu0 %v1953_v56 }
  0xb1   :  { %1428 = vmatprep.subr.bf16.mxu1 %v1956_v57 }
  0xb3   :  { %1386 = vmatpush2.bf16.msra.mxu0 %v1951_v58 }
  0xb4   :  { %1429 = vmatpush2.bf16.msra.mxu1 %v1954_v59  ;;  %1387 = vmatprep.subr.bf16.mxu0 %v1959_v60 }
  0xb5   :  { %1430 = vmatprep.subr.bf16.mxu1 %v1962_v61 }
  0xb7   :  { %1388 = vmatpush2.bf16.msra.mxu0 %v1957_v62 }
  0xb8   :  { %1431 = vmatpush2.bf16.msra.mxu1 %v1960_v63  ;;  %1389 = vmatprep.subr.bf16.mxu0 %v1965_v0 }
  0xb9   :  { %1432 = vmatprep.subr.bf16.mxu1 %v1968_v1 }
  0xbb   :  { %1390 = vmatpush2.bf16.msra.mxu0 %v1963_v2 }
  0xbc   :  { %1433 = vmatpush2.bf16.msra.mxu1 %v1966_v3  ;;  %1391 = vmatprep.subr.bf16.mxu0 %v1971_v6 }
  0xbd   :  { %1434 = vmatprep.subr.bf16.mxu1 %v1974_v7 }
  0xbf   :  { %1392 = vmatpush2.bf16.msra.mxu0 %v1969_v8 }
  0xc0   :  { %1435 = vmatpush2.bf16.msra.mxu1 %v1972_v9 }
  0xc2   :  { %1394 = vmatmul.mubr.bf16.vlgmr.msra.gmra.mxu0 %v2208_v4 }
  0xc3   :  { %1437 = vmatmul.mubr.bf16.vlgmr.msra.gmra.mxu1 %v2213_v5 }
 0x102   :  { %v1223_v10 = vpop.f32.mrf.mxu0 }
 0x103   :  { %v1266_v11 = vpop.f32.mrf.mxu1 }
 0x104   :  { %v1225_v12 = vpop.f32.mrf.mxu0  ;;  %v1267_v25 = vadd.f32 %v1266_v11, %v1223_v10 }
 0x105   :  { %v1268_v13 = vpop.f32.mrf.mxu1 }
 0x106   :  { %v1269_v14 = vadd.f32 %v1268_v13, %v1225_v12  ;;  %v1227_v15 = vpop.f32.mrf.mxu0  ;;  %v1447_v31 = vmul.f32 %v1267_v25, %v1267_v25 }
 0x107   :  { %v1270_v16 = vpop.f32.mrf.mxu1 }
 0x108   :  { %v1229_v17 = vpop.f32.mrf.mxu0  ;;  %v1271_v5 = vadd.f32 %v1270_v16, %v1227_v15  ;;  %v1448_v49 = vmul.f32 %v1269_v14, %v1269_v14 }
 0x109   :  { %v1272_v18 = vpop.f32.mrf.mxu1 }
 0x10a   :  { %v1273_v19 = vadd.f32 %v1272_v18, %v1229_v17  ;;  %v1450_v32 = vmul.f32 %v1271_v5, %v1271_v5 }
 0x10c   :  { %v1451_v53 = vmul.f32 %v1273_v19, %v1273_v19 }
 0x142   :  { %v1309_v20 = vpop.f32.mrf.mxu0 }
 0x143   :  { %v1352_v48 = vpop.f32.mrf.mxu1 }
 0x144   :  { %v1353_v50 = vadd.f32 %v1352_v48, %v1309_v20  ;;  %v1311_v21 = vpop.f32.mrf.mxu0 }
 0x145   :  { %v1354_v22 = vpop.f32.mrf.mxu1 }
 0x146   :  { %v1355_v23 = vadd.f32 %v1354_v22, %v1311_v21  ;;  %v1313_v24 = vpop.f32.mrf.mxu0  ;;  %v1449_v57 = vmul.f32 %v1353_v50, %v1353_v50 }
 0x147   :  { %v1356_v4 = vpop.f32.mrf.mxu1 }
 0x148   :  { %v1357_v26 = vadd.f32 %v1356_v4, %v1313_v24  ;;  %v1315_v27 = vpop.f32.mrf.mxu0  ;;  %v1453_v29 = vmul.f32 %v1355_v23, %v1355_v23 }
 0x149   :  { %v1358_v28 = vpop.f32.mrf.mxu1 }
 0x14a   :  { %v1359_v30 = vadd.f32 %v1358_v28, %v1315_v27  ;;  %v1459_v34 = vadd.f32 %v1453_v29, %v1447_v31  ;;  %v1452_v58 = vmul.f32 %v1357_v26, %v1357_v26 }
 0x14c   :  { %v1456_v33 = vmul.f32 %v1359_v30, %v1359_v30 }
 0x14e   :  { %v1462_v35 = vadd.f32 %v1456_v33, %v1450_v32 }
 0x150   :  { %v1465_v36 = vmin.f32 %v1459_v34, %v1462_v35  ;;  %v1471_v37 = vmax.f32 %v1459_v34, %v1462_v35 }
 0x152   :  { %1468 = vst [vmem:[%s2623_s2] sm:$0xff] %v1465_v36  ;;  %1474 = vst [vmem:[%s2624_s3] sm:$0xff] %v1471_v37 }
 0x182   :  { %v1395_v38 = vpop.f32.mrf.mxu0 }
 0x183   :  { %v1438_v39 = vpop.f32.mrf.mxu1 }
 0x184   :  { %v1439_v40 = vadd.f32 %v1438_v39, %v1395_v38  ;;  %v1397_v41 = vpop.f32.mrf.mxu0 }
 0x185   :  { %v1440_v42 = vpop.f32.mrf.mxu1 }
 0x186   :  { %v1441_v43 = vadd.f32 %v1440_v42, %v1397_v41  ;;  %v1399_v44 = vpop.f32.mrf.mxu0  ;;  %v1454_v46 = vmul.f32 %v1439_v40, %v1439_v40 }
 0x187   :  { %v1442_v45 = vpop.f32.mrf.mxu1 }
 0x188   :  { %v1443_v47 = vadd.f32 %v1442_v45, %v1399_v44  ;;  %v1401_v51 = vpop.f32.mrf.mxu0  ;;  %v1455_v54 = vmul.f32 %v1441_v43, %v1441_v43  ;;  %v1460_v59 = vadd.f32 %v1454_v46, %v1448_v49 }
 0x189   :  { %v1444_v52 = vpop.f32.mrf.mxu1 }
 0x18a   :  { %v1457_v55 = vmul.f32 %v1443_v47, %v1443_v47  ;;  %v1445_v56 = vadd.f32 %v1444_v52, %v1401_v51  ;;  %v1461_v62 = vadd.f32 %v1455_v54, %v1449_v57 }
 0x18c   :  { %v1463_v60 = vadd.f32 %v1457_v55, %v1451_v53  ;;  %v1458_v61 = vmul.f32 %v1445_v56, %v1445_v56 }
 0x18e   :  { %v1466_v63 = vmin.f32 %v1460_v59, %v1463_v60  ;;  %v1472_v0 = vmax.f32 %v1460_v59, %v1463_v60  ;;  %v1464_v1 = vadd.f32 %v1458_v61, %v1452_v58 }
 0x190   :  { %1469 = vst [vmem:[%s2623_s2 + $0x8] sm:$0xff] %v1466_v63  ;;  %1475 = vst [vmem:[%s2624_s3 + $0x8] sm:$0xff] %v1472_v0  ;;  %v1467_v2 = vmin.f32 %v1461_v62, %v1464_v1  ;;  %v1473_v3 = vmax.f32 %v1461_v62, %v1464_v1 }
 0x192   :  { %1470 = vst [vmem:[%s2623_s2 + $0x10] sm:$0xff] %v1467_v2  ;;  %1476 = vst [vmem:[%s2624_s3 + $0x10] sm:$0xff] %v1473_v3 }

// kernel: spectrogram_forward.3
= control target key start
LH: loop header
LB: loop body
LE: loop exit
PB: predicated region body
PF: predicated region fallthrough
CT: control target
= control target key end

     0   :  { %8 = vsyncpa [#allocation3], 0  ;;  %s2662_s0 = inlined_call_operand.vmem [shape: f32[2], index: 0, kind: input, shape index: {}]   ;;  %s2663_s1 = inlined_call_operand.vmem [shape: bf16[16,512], index: 1, kind: input, shape index: {}]   ;;  %s2664_s2 = inlined_call_operand.vmem [shape: bf16[512,768], index: 2, kind: input, shape index: {}]   ;;  %s2665_s3 = inlined_call_operand.vmem [shape: f32[16,384], index: 3, kind: output, shape index: {}]  }
   0x1   :  { %s15_s14 = sshll.u32 %s2662_s0, 4  ;;  %s16_s14 = int_to_ptr.vmem [resolvable:$true] %s15_s14 }
   0x2   :  { %s1998_s15 = scalar_lea.vmem %s16_s14, 16  ;;  %p2003_p1 = scmp.lt.s32.totalorder %s16_s14, %s16_s14 }
   0x3   :  { %p1999_p0 = scmp.ne.s32.totalorder %s16_s14, %s1998_s15  ;;  %p2004_p2 = scmp.lt.s32.totalorder %s1998_s15, %s1998_s15 }
   0x5   :  { %p2005_p3 = por %p2004_p2, %p2003_p1 }
   0x7   :  { %p2006_p4 = pnand %p2005_p3, %p1999_p0 }
   0x9   :  { %2009 = shalt.err (!%p2006_p4)
}
   0xa   :  { %s2012_s16 = smov [#allocation2]  }
   0xb   :  { %18 = dma.vmem_to_smem %s16_s14, 16, %s2012_s16, [#allocation3]  }
   0xc   :  { %2010 = dma.done.wait [#allocation3], 16  }
   0xd   :  { %2011 = vsyncadd [#allocation3], 4294967280 }
   0xe   :  { %26 = sfence }
   0xf   :  { %v1704_v0 = vld [vmem:[%s2664_s2 + $0x154] ss:$24 sps:$4 sm:$0xff]   ;;  %v1708_v2 = vld [vmem:[%s2664_s2 + $0x150] ss:$24 sps:$4 sm:$0xff]   ;;  %v1710_v4 = vld [vmem:[%s2664_s2 + $0x124] ss:$24 sps:$4 sm:$0xff]  }
  0x10   :  { %v1706_v1 = vld [vmem:[%s2664_s2 + $0x454] ss:$24 sps:$4 sm:$0xff]   ;;  %1203 = vmatprep.subr.bf16.mxu0 %v1704_v0  ;;  %v1709_v3 = vld [vmem:[%s2664_s2 + $0x450] ss:$24 sps:$4 sm:$0xff]   ;;  %v1712_v5 = vld [vmem:[%s2664_s2 + $0x424] ss:$24 sps:$4 sm:$0xff]  }
  0x11   :  { %1246 = vmatprep.subr.bf16.mxu1 %v1706_v1  ;;  %1204 = vmatpush1.bf16.msra.mxu0 %v1708_v2  ;;  %v1714_v6 = vld [vmem:[%s2664_s2 + $0x120] ss:$24 sps:$4 sm:$0xff]   ;;  %v1716_v8 = vld [vmem:[%s2664_s2 + $0xf4] ss:$24 sps:$4 sm:$0xff]   ;;  %v1720_v10 = vld [vmem:[%s2664_s2 + $0xf0] ss:$24 sps:$4 sm:$0xff]  }
  0x12   :  { %1247 = vmatpush1.bf16.msra.mxu1 %v1709_v3  ;;  %1205 = vmatprep.subr.bf16.mxu0 %v1710_v4  ;;  %v1715_v7 = vld [vmem:[%s2664_s2 + $0x420] ss:$24 sps:$4 sm:$0xff]   ;;  %v1718_v9 = vld [vmem:[%s2664_s2 + $0x3f4] ss:$24 sps:$4 sm:$0xff]   ;;  %v1721_v11 = vld [vmem:[%s2664_s2 + $0x3f0] ss:$24 sps:$4 sm:$0xff]  }
  0x13   :  { %1248 = vmatprep.subr.bf16.mxu1 %v1712_v5  ;;  %v1722_v12 = vld [vmem:[%s2664_s2 + $0xc4] ss:$24 sps:$4 sm:$0xff]   ;;  %v1726_v14 = vld [vmem:[%s2664_s2 + $0xc0] ss:$24 sps:$4 sm:$0xff]   ;;  %v1728_v16 = vld [vmem:[%s2664_s2 + $0x94] ss:$24 sps:$4 sm:$0xff]  }
  0x14   :  { %v1724_v13 = vld [vmem:[%s2664_s2 + $0x3c4] ss:$24 sps:$4 sm:$0xff]   ;;  %v1727_v15 = vld [vmem:[%s2664_s2 + $0x3c0] ss:$24 sps:$4 sm:$0xff]   ;;  %v1730_v17 = vld [vmem:[%s2664_s2 + $0x394] ss:$24 sps:$4 sm:$0xff]  }
  0x15   :  { %1206 = vmatpush1.bf16.msra.mxu0 %v1714_v6  ;;  %v1732_v18 = vld [vmem:[%s2664_s2 + $0x90] ss:$24 sps:$4 sm:$0xff]   ;;  %v1734_v20 = vld [vmem:[%s2664_s2 + $0x64] ss:$24 sps:$4 sm:$0xff]   ;;  %v1738_v22 = vld [vmem:[%s2664_s2 + $0x60] ss:$24 sps:$4 sm:$0xff]  }
  0x16   :  { %1249 = vmatpush1.bf16.msra.mxu1 %v1715_v7  ;;  %1207 = vmatprep.subr.bf16.mxu0 %v1716_v8  ;;  %v1733_v19 = vld [vmem:[%s2664_s2 + $0x390] ss:$24 sps:$4 sm:$0xff]   ;;  %v1736_v21 = vld [vmem:[%s2664_s2 + $0x364] ss:$24 sps:$4 sm:$0xff]   ;;  %v1739_v23 = vld [vmem:[%s2664_s2 + $0x360] ss:$24 sps:$4 sm:$0xff]  }
  0x17   :  { %1250 = vmatprep.subr.bf16.mxu1 %v1718_v9  ;;  %v1740_v24 = vld [vmem:[%s2664_s2 + $0x34] ss:$24 sps:$4 sm:$0xff]   ;;  %v1744_v26 = vld [vmem:[%s2664_s2 + $0x30] ss:$24 sps:$4 sm:$0xff]   ;;  %v1746_v28 = vld [vmem:[%s2664_s2 + $0x4] ss:$24 sps:$4 sm:$0xff]  }
  0x18   :  { %v1742_v25 = vld [vmem:[%s2664_s2 + $0x334] ss:$24 sps:$4 sm:$0xff]   ;;  %v1745_v27 = vld [vmem:[%s2664_s2 + $0x330] ss:$24 sps:$4 sm:$0xff]   ;;  %v1748_v29 = vld [vmem:[%s2664_s2 + $0x304] ss:$24 sps:$4 sm:$0xff]  }
  0x19   :  { %1208 = vmatpush1.bf16.msra.mxu0 %v1720_v10  ;;  %v1750_v30 = vld [vmem:[%s2664_s2] ss:$24 sps:$4 sm:$0xff]   ;;  %v1752_v32 = vld [vmem:[%s2664_s2 + $0x2d4] ss:$24 sps:$4 sm:$0xff]   ;;  %v1756_v34 = vld [vmem:[%s2664_s2 + $0x2d0] ss:$24 sps:$4 sm:$0xff]  }
  0x1a   :  { %1251 = vmatpush1.bf16.msra.mxu1 %v1721_v11  ;;  %1209 = vmatprep.subr.bf16.mxu0 %v1722_v12  ;;  %v1751_v31 = vld [vmem:[%s2664_s2 + $0x300] ss:$24 sps:$4 sm:$0xff]   ;;  %v1754_v33 = vld [vmem:[%s2664_s2 + $0x5d4] ss:$24 sps:$4 sm:$0xff]   ;;  %v1757_v35 = vld [vmem:[%s2664_s2 + $0x5d0] ss:$24 sps:$4 sm:$0xff]  }
  0x1b   :  { %1252 = vmatprep.subr.bf16.mxu1 %v1724_v13  ;;  %v1758_v36 = vld [vmem:[%s2664_s2 + $0x2a4] ss:$24 sps:$4 sm:$0xff]   ;;  %v1762_v38 = vld [vmem:[%s2664_s2 + $0x2a0] ss:$24 sps:$4 sm:$0xff]   ;;  %v1764_v40 = vld [vmem:[%s2664_s2 + $0x274] ss:$24 sps:$4 sm:$0xff]  }
  0x1c   :  { %v1760_v37 = vld [vmem:[%s2664_s2 + $0x5a4] ss:$24 sps:$4 sm:$0xff]   ;;  %v1763_v39 = vld [vmem:[%s2664_s2 + $0x5a0] ss:$24 sps:$4 sm:$0xff]   ;;  %v1766_v41 = vld [vmem:[%s2664_s2 + $0x574] ss:$24 sps:$4 sm:$0xff]  }
  0x1d   :  { %1210 = vmatpush1.bf16.msra.mxu0 %v1726_v14  ;;  %v1768_v42 = vld [vmem:[%s2664_s2 + $0x270] ss:$24 sps:$4 sm:$0xff]   ;;  %v1770_v44 = vld [vmem:[%s2664_s2 + $0x244] ss:$24 sps:$4 sm:$0xff]   ;;  %v1774_v46 = vld [vmem:[%s2664_s2 + $0x240] ss:$24 sps:$4 sm:$0xff]  }
  0x1e   :  { %1253 = vmatpush1.bf16.msra.mxu1 %v1727_v15  ;;  %1211 = vmatprep.subr.bf16.mxu0 %v1728_v16  ;;  %v1769_v43 = vld [vmem:[%s2664_s2 + $0x570] ss:$24 sps:$4 sm:$0xff]   ;;  %v1772_v45 = vld [vmem:[%s2664_s2 + $0x544] ss:$24 sps:$4 sm:$0xff]   ;;  %v1775_v47 = vld [vmem:[%s2664_s2 + $0x540] ss:$24 sps:$4 sm:$0xff]  }
  0x1f   :  { %1254 = vmatprep.subr.bf16.mxu1 %v1730_v17  ;;  %v2183_v48 = vld [vmem:[%s2663_s1 + $0x4] ss:$16 sps:$4 sm:$0xff]   ;;  %v2191_v50 = vld [vmem:[%s2663_s1 + $0xc] ss:$16 sps:$4 sm:$0xff]   ;;  %v1780_v52 = vld [vmem:[%s2664_s2 + $0x210] ss:$24 sps:$4 sm:$0xff]  }
  0x20   :  { %v1776_v49 = vld [vmem:[%s2664_s2 + $0x214] ss:$24 sps:$4 sm:$0xff]   ;;  %1235 = vmatprep.mubr.bf16.mxu0 %v2183_v48  ;;  %1278 = vmatprep.mubr.bf16.mxu1 %v2191_v50  ;;  %v1781_v53 = vld [vmem:[%s2664_s2 + $0x510] ss:$24 sps:$4 sm:$0xff]   ;;  %v1782_v54 = vld [vmem:[%s2664_s2 + $0x1e4] ss:$24 sps:$4 sm:$0xff]  }
  0x21   :  { %1212 = vmatpush1.bf16.msra.mxu0 %v1732_v18  ;;  %v1778_v51 = vld [vmem:[%s2664_s2 + $0x514] ss:$24 sps:$4 sm:$0xff]   ;;  %v1784_v55 = vld [vmem:[%s2664_s2 + $0x4e4] ss:$24 sps:$4 sm:$0xff]   ;;  %v1786_v56 = vld [vmem:[%s2664_s2 + $0x1e0] ss:$24 sps:$4 sm:$0xff]  }
  0x22   :  { %1255 = vmatpush1.bf16.msra.mxu1 %v1733_v19  ;;  %1213 = vmatprep.subr.bf16.mxu0 %v1734_v20  ;;  %v1787_v57 = vld [vmem:[%s2664_s2 + $0x4e0] ss:$24 sps:$4 sm:$0xff]   ;;  %v1788_v58 = vld [vmem:[%s2664_s2 + $0x1b4] ss:$24 sps:$4 sm:$0xff]   ;;  %v1792_v60 = vld [vmem:[%s2664_s2 + $0x1b0] ss:$24 sps:$4 sm:$0xff]  }
  0x23   :  { %1256 = vmatprep.subr.bf16.mxu1 %v1736_v21  ;;  %v1790_v59 = vld [vmem:[%s2664_s2 + $0x4b4] ss:$24 sps:$4 sm:$0xff]   ;;  %v1793_v61 = vld [vmem:[%s2664_s2 + $0x4b0] ss:$24 sps:$4 sm:$0xff]   ;;  %v1794_v62 = vld [vmem:[%s2664_s2 + $0x184] ss:$24 sps:$4 sm:$0xff]  }
  0x24   :  { %v1796_v63 = vld [vmem:[%s2664_s2 + $0x484] ss:$24 sps:$4 sm:$0xff]   ;;  %v1798_v0 = vld [vmem:[%s2664_s2 + $0x180] ss:$24 sps:$4 sm:$0xff]   ;;  %s1479_s8 = sld [smem:[#allocation2]] }
  0x25   :  { %1214 = vmatpush1.bf16.msra.mxu0 %v1738_v22  ;;  %v1799_v1 = vld [vmem:[%s2664_s2 + $0x480] ss:$24 sps:$4 sm:$0xff]   ;;  %v1808_v2 = vld [vmem:[%s2664_s2 + $0x15c] ss:$24 sps:$4 sm:$0xff]   ;;  %v1814_v8 = vld [vmem:[%s2664_s2 + $0x12c] ss:$24 sps:$4 sm:$0xff]  }
  0x26   :  { %1257 = vmatpush1.bf16.msra.mxu1 %v1739_v23  ;;  %1215 = vmatprep.subr.bf16.mxu0 %v1740_v24  ;;  %v1811_v3 = vld [vmem:[%s2664_s2 + $0x45c] ss:$24 sps:$4 sm:$0xff]   ;;  %v2249_v4 = vld [vmem:[%s2663_s1] ss:$16 sps:$4 sm:$0xff]   ;;  %v2254_v5 = vld [vmem:[%s2663_s1 + $0x8] ss:$16 sps:$4 sm:$0xff]  }
  0x27   :  { %1258 = vmatprep.subr.bf16.mxu1 %v1742_v25  ;;  %v1806_v6 = vld [vmem:[%s2664_s2 + $0x158] ss:$24 sps:$4 sm:$0xff]   ;;  %v1817_v9 = vld [vmem:[%s2664_s2 + $0x42c] ss:$24 sps:$4 sm:$0xff]   ;;  %v1812_v10 = vld [vmem:[%s2664_s2 + $0x128] ss:$24 sps:$4 sm:$0xff]  }
  0x28   :  { %v1809_v7 = vld [vmem:[%s2664_s2 + $0x458] ss:$24 sps:$4 sm:$0xff]   ;;  %v1815_v11 = vld [vmem:[%s2664_s2 + $0x428] ss:$24 sps:$4 sm:$0xff]   ;;  %v1820_v12 = vld [vmem:[%s2664_s2 + $0xfc] ss:$24 sps:$4 sm:$0xff]  }
  0x29   :  { %1216 = vmatpush1.bf16.msra.mxu0 %v1744_v26  ;;  %v1823_v13 = vld [vmem:[%s2664_s2 + $0x3fc] ss:$24 sps:$4 sm:$0xff]   ;;  %v1818_v14 = vld [vmem:[%s2664_s2 + $0xf8] ss:$24 sps:$4 sm:$0xff]   ;;  %v1826_v16 = vld [vmem:[%s2664_s2 + $0xcc] ss:$24 sps:$4 sm:$0xff]  }
  0x2a   :  { %1259 = vmatpush1.bf16.msra.mxu1 %v1745_v27  ;;  %1217 = vmatprep.subr.bf16.mxu0 %v1746_v28  ;;  %v1821_v15 = vld [vmem:[%s2664_s2 + $0x3f8] ss:$24 sps:$4 sm:$0xff]   ;;  %v1829_v17 = vld [vmem:[%s2664_s2 + $0x3cc] ss:$24 sps:$4 sm:$0xff]   ;;  %v1824_v18 = vld [vmem:[%s2664_s2 + $0xc8] ss:$24 sps:$4 sm:$0xff]  }
  0x2b   :  { %1260 = vmatprep.subr.bf16.mxu1 %v1748_v29  ;;  %v1827_v19 = vld [vmem:[%s2664_s2 + $0x3c8] ss:$24 sps:$4 sm:$0xff]   ;;  %v1832_v20 = vld [vmem:[%s2664_s2 + $0x9c] ss:$24 sps:$4 sm:$0xff]   ;;  %v1830_v22 = vld [vmem:[%s2664_s2 + $0x98] ss:$24 sps:$4 sm:$0xff]  }
  0x2c   :  { %v1835_v21 = vld [vmem:[%s2664_s2 + $0x39c] ss:$24 sps:$4 sm:$0xff]   ;;  %v1833_v23 = vld [vmem:[%s2664_s2 + $0x398] ss:$24 sps:$4 sm:$0xff]   ;;  %v1838_v24 = vld [vmem:[%s2664_s2 + $0x6c] ss:$24 sps:$4 sm:$0xff]  }
  0x2d   :  { %1218 = vmatpush1.bf16.msra.mxu0 %v1750_v30  ;;  %v1841_v25 = vld [vmem:[%s2664_s2 + $0x36c] ss:$24 sps:$4 sm:$0xff]   ;;  %v1836_v26 = vld [vmem:[%s2664_s2 + $0x68] ss:$24 sps:$4 sm:$0xff]   ;;  %v1844_v28 = vld [vmem:[%s2664_s2 + $0x3c] ss:$24 sps:$4 sm:$0xff]  }
  0x2e   :  { %1261 = vmatpush1.bf16.msra.mxu1 %v1751_v31  ;;  %1219 = vmatprep.subr.bf16.mxu0 %v1752_v32  ;;  %v1839_v27 = vld [vmem:[%s2664_s2 + $0x368] ss:$24 sps:$4 sm:$0xff]   ;;  %v1847_v29 = vld [vmem:[%s2664_s2 + $0x33c] ss:$24 sps:$4 sm:$0xff]   ;;  %v1842_v30 = vld [vmem:[%s2664_s2 + $0x38] ss:$24 sps:$4 sm:$0xff]  }
  0x2f   :  { %1262 = vmatprep.subr.bf16.mxu1 %v1754_v33  ;;  %v1845_v31 = vld [vmem:[%s2664_s2 + $0x338] ss:$24 sps:$4 sm:$0xff]   ;;  %v1850_v32 = vld [vmem:[%s2664_s2 + $0xc] ss:$24 sps:$4 sm:$0xff]  }
  0x30   :  { %v1853_v33 = vld [vmem:[%s2664_s2 + $0x30c] ss:$24 sps:$4 sm:$0xff]  }
  0x31   :  { %1220 = vmatpush2.bf16.msra.mxu0 %v1756_v34  ;;  %v1848_v34 = vld [vmem:[%s2664_s2 + $0x8] ss:$24 sps:$4 sm:$0xff]  }
  0x32   :  { %1263 = vmatpush2.bf16.msra.mxu1 %v1757_v35  ;;  %1221 = vmatprep.subr.bf16.mxu0 %v1758_v36  ;;  %v1851_v35 = vld [vmem:[%s2664_s2 + $0x308] ss:$24 sps:$4 sm:$0xff]   ;;  %v1856_v36 = vld [vmem:[%s2664_s2 + $0x2dc] ss:$24 sps:$4 sm:$0xff]  }
  0x33   :  { %1264 = vmatprep.subr.bf16.mxu1 %v1760_v37  ;;  %v1859_v37 = vld [vmem:[%s2664_s2 + $0x5dc] ss:$24 sps:$4 sm:$0xff]  }
  0x35   :  { %1222 = vmatpush2.bf16.msra.mxu0 %v1762_v38  ;;  %v1854_v38 = vld [vmem:[%s2664_s2 + $0x2d8] ss:$24 sps:$4 sm:$0xff]  }
  0x36   :  { %1265 = vmatpush2.bf16.msra.mxu1 %v1763_v39  ;;  %1223 = vmatprep.subr.bf16.mxu0 %v1764_v40  ;;  %v1857_v39 = vld [vmem:[%s2664_s2 + $0x5d8] ss:$24 sps:$4 sm:$0xff]   ;;  %v1862_v40 = vld [vmem:[%s2664_s2 + $0x2ac] ss:$24 sps:$4 sm:$0xff]  }
  0x37   :  { %1266 = vmatprep.subr.bf16.mxu1 %v1766_v41  ;;  %v1865_v41 = vld [vmem:[%s2664_s2 + $0x5ac] ss:$24 sps:$4 sm:$0xff]  }
  0x39   :  { %1224 = vmatpush2.bf16.msra.mxu0 %v1768_v42  ;;  %v1860_v42 = vld [vmem:[%s2664_s2 + $0x2a8] ss:$24 sps:$4 sm:$0xff]  }
  0x3a   :  { %1267 = vmatpush2.bf16.msra.mxu1 %v1769_v43  ;;  %1225 = vmatprep.subr.bf16.mxu0 %v1770_v44  ;;  %v1863_v43 = vld [vmem:[%s2664_s2 + $0x5a8] ss:$24 sps:$4 sm:$0xff]   ;;  %v1868_v44 = vld [vmem:[%s2664_s2 + $0x27c] ss:$24 sps:$4 sm:$0xff]  }
  0x3b   :  { %1268 = vmatprep.subr.bf16.mxu1 %v1772_v45  ;;  %v1871_v45 = vld [vmem:[%s2664_s2 + $0x57c] ss:$24 sps:$4 sm:$0xff]  }
  0x3d   :  { %1226 = vmatpush2.bf16.msra.mxu0 %v1774_v46  ;;  %v1866_v46 = vld [vmem:[%s2664_s2 + $0x278] ss:$24 sps:$4 sm:$0xff]  }
  0x3e   :  { %1269 = vmatpush2.bf16.msra.mxu1 %v1775_v47  ;;  %1227 = vmatprep.subr.bf16.mxu0 %v1776_v49  ;;  %v1869_v47 = vld [vmem:[%s2664_s2 + $0x578] ss:$24 sps:$4 sm:$0xff]   ;;  %v1874_v49 = vld [vmem:[%s2664_s2 + $0x24c] ss:$24 sps:$4 sm:$0xff]  }
  0x3f   :  { %1270 = vmatprep.subr.bf16.mxu1 %v1778_v51  ;;  %v1877_v51 = vld [vmem:[%s2664_s2 + $0x54c] ss:$24 sps:$4 sm:$0xff]  }
  0x41   :  { %1228 = vmatpush2.bf16.msra.mxu0 %v1780_v52  ;;  %v1872_v52 = vld [vmem:[%s2664_s2 + $0x248] ss:$24 sps:$4 sm:$0xff]  }
  0x42   :  { %1271 = vmatpush2.bf16.msra.mxu1 %v1781_v53  ;;  %1229 = vmatprep.subr.bf16.mxu0 %v1782_v54  ;;  %v1875_v53 = vld [vmem:[%s2664_s2 + $0x548] ss:$24 sps:$4 sm:$0xff]   ;;  %v1880_v54 = vld [vmem:[%s2664_s2 + $0x21c] ss:$24 sps:$4 sm:$0xff]  }
  0x43   :  { %1272 = vmatprep.subr.bf16.mxu1 %v1784_v55  ;;  %v1883_v55 = vld [vmem:[%s2664_s2 + $0x51c] ss:$24 sps:$4 sm:$0xff]  }
  0x45   :  { %1230 = vmatpush2.bf16.msra.mxu0 %v1786_v56  ;;  %v1878_v56 = vld [vmem:[%s2664_s2 + $0x218] ss:$24 sps:$4 sm:$0xff]  }
  0x46   :  { %1273 = vmatpush2.bf16.msra.mxu1 %v1787_v57  ;;  %1231 = vmatprep.subr.bf16.mxu0 %v1788_v58  ;;  %v1881_v57 = vld [vmem:[%s2664_s2 + $0x518] ss:$24 sps:$4 sm:$0xff]   ;;  %v1886_v58 = vld [vmem:[%s2664_s2 + $0x1ec] ss:$24 sps:$4 sm:$0xff]  }
  0x47   :  { %1274 = vmatprep.subr.bf16.mxu1 %v1790_v59  ;;  %v1889_v59 = vld [vmem:[%s2664_s2 + $0x4ec] ss:$24 sps:$4 sm:$0xff]  }
  0x49   :  { %1232 = vmatpush2.bf16.msra.mxu0 %v1792_v60  ;;  %v1884_v60 = vld [vmem:[%s2664_s2 + $0x1e8] ss:$24 sps:$4 sm:$0xff]  }
  0x4a   :  { %1275 = vmatpush2.bf16.msra.mxu1 %v1793_v61  ;;  %1233 = vmatprep.subr.bf16.mxu0 %v1794_v62  ;;  %v1887_v61 = vld [vmem:[%s2664_s2 + $0x4e8] ss:$24 sps:$4 sm:$0xff]   ;;  %v1892_v62 = vld [vmem:[%s2664_s2 + $0x1bc] ss:$24 sps:$4 sm:$0xff]  }
  0x4b   :  { %1276 = vmatprep.subr.bf16.mxu1 %v1796_v63  ;;  %v1895_v63 = vld [vmem:[%s2664_s2 + $0x4bc] ss:$24 sps:$4 sm:$0xff]  }
  0x4d   :  { %1234 = vmatpush2.bf16.msra.mxu0 %v1798_v0  ;;  %v1890_v0 = vld [vmem:[%s2664_s2 + $0x1b8] ss:$24 sps:$4 sm:$0xff]  }
  0x4e   :  { %1277 = vmatpush2.bf16.msra.mxu1 %v1799_v1  ;;  %1289 = vmatprep.subr.bf16.mxu0 %v1808_v2  ;;  %v1893_v1 = vld [vmem:[%s2664_s2 + $0x4b8] ss:$24 sps:$4 sm:$0xff]   ;;  %v1898_v2 = vld [vmem:[%s2664_s2 + $0x18c] ss:$24 sps:$4 sm:$0xff]  }
  0x4f   :  { %1332 = vmatprep.subr.bf16.mxu1 %v1811_v3  ;;  %v1901_v3 = vld [vmem:[%s2664_s2 + $0x48c] ss:$24 sps:$4 sm:$0xff]  }
  0x50   :  { %1236 = vmatmul.mubr.bf16.vlgmr.msra.gmra.mxu0 %v2249_v4 }
  0x51   :  { %1279 = vmatmul.mubr.bf16.vlgmr.msra.gmra.mxu1 %v2254_v5  ;;  %1290 = vmatpush1.bf16.msra.mxu0 %v1806_v6  ;;  %v1896_v6 = vld [vmem:[%s2664_s2 + $0x188] ss:$24 sps:$4 sm:$0xff]  }
  0x52   :  { %1333 = vmatpush1.bf16.msra.mxu1 %v1809_v7  ;;  %1291 = vmatprep.subr.bf16.mxu0 %v1814_v8  ;;  %v1899_v7 = vld [vmem:[%s2664_s2 + $0x488] ss:$24 sps:$4 sm:$0xff]   ;;  %v1904_v8 = vld [vmem:[%s2664_s2 + $0x164] ss:$24 sps:$4 sm:$0xff]  }
  0x53   :  { %1334 = vmatprep.subr.bf16.mxu1 %v1817_v9  ;;  %1321 = vmatprep.mubr.bf16.mxu0 %v2183_v48  ;;  %v1907_v9 = vld [vmem:[%s2664_s2 + $0x464] ss:$24 sps:$4 sm:$0xff]  }
  0x54   :  { %1364 = vmatprep.mubr.bf16.mxu1 %v2191_v50 }
  0x55   :  { %1292 = vmatpush1.bf16.msra.mxu0 %v1812_v10  ;;  %v1902_v10 = vld [vmem:[%s2664_s2 + $0x160] ss:$24 sps:$4 sm:$0xff]  }
  0x56   :  { %1335 = vmatpush1.bf16.msra.mxu1 %v1815_v11  ;;  %1293 = vmatprep.subr.bf16.mxu0 %v1820_v12  ;;  %v1905_v11 = vld [vmem:[%s2664_s2 + $0x460] ss:$24 sps:$4 sm:$0xff]   ;;  %v1910_v12 = vld [vmem:[%s2664_s2 + $0x134] ss:$24 sps:$4 sm:$0xff]  }
  0x57   :  { %1336 = vmatprep.subr.bf16.mxu1 %v1823_v13  ;;  %v1913_v13 = vld [vmem:[%s2664_s2 + $0x434] ss:$24 sps:$4 sm:$0xff]  }
  0x59   :  { %1294 = vmatpush1.bf16.msra.mxu0 %v1818_v14  ;;  %v1908_v14 = vld [vmem:[%s2664_s2 + $0x130] ss:$24 sps:$4 sm:$0xff]  }
  0x5a   :  { %1337 = vmatpush1.bf16.msra.mxu1 %v1821_v15  ;;  %1295 = vmatprep.subr.bf16.mxu0 %v1826_v16  ;;  %v1911_v15 = vld [vmem:[%s2664_s2 + $0x430] ss:$24 sps:$4 sm:$0xff]   ;;  %v1916_v16 = vld [vmem:[%s2664_s2 + $0x104] ss:$24 sps:$4 sm:$0xff]  }
  0x5b   :  { %1338 = vmatprep.subr.bf16.mxu1 %v1829_v17  ;;  %v1919_v17 = vld [vmem:[%s2664_s2 + $0x404] ss:$24 sps:$4 sm:$0xff]  }
  0x5d   :  { %1296 = vmatpush1.bf16.msra.mxu0 %v1824_v18  ;;  %v1914_v18 = vld [vmem:[%s2664_s2 + $0x100] ss:$24 sps:$4 sm:$0xff]  }
  0x5e   :  { %1339 = vmatpush1.bf16.msra.mxu1 %v1827_v19  ;;  %1297 = vmatprep.subr.bf16.mxu0 %v1832_v20  ;;  %v1917_v19 = vld [vmem:[%s2664_s2 + $0x400] ss:$24 sps:$4 sm:$0xff]   ;;  %v1922_v20 = vld [vmem:[%s2664_s2 + $0xd4] ss:$24 sps:$4 sm:$0xff]  }
  0x5f   :  { %1340 = vmatprep.subr.bf16.mxu1 %v1835_v21  ;;  %v1923_v21 = vld [vmem:[%s2664_s2 + $0x3d0] ss:$24 sps:$4 sm:$0xff]  }
  0x61   :  { %1298 = vmatpush1.bf16.msra.mxu0 %v1830_v22  ;;  %v1928_v22 = vld [vmem:[%s2664_s2 + $0xa4] ss:$24 sps:$4 sm:$0xff]  }
  0x62   :  { %1341 = vmatpush1.bf16.msra.mxu1 %v1833_v23  ;;  %1299 = vmatprep.subr.bf16.mxu0 %v1838_v24  ;;  %v1931_v23 = vld [vmem:[%s2664_s2 + $0x3a4] ss:$24 sps:$4 sm:$0xff]   ;;  %v1926_v24 = vld [vmem:[%s2664_s2 + $0xa0] ss:$24 sps:$4 sm:$0xff]  }
  0x63   :  { %1342 = vmatprep.subr.bf16.mxu1 %v1841_v25  ;;  %v1929_v25 = vld [vmem:[%s2664_s2 + $0x3a0] ss:$24 sps:$4 sm:$0xff]  }
  0x65   :  { %1300 = vmatpush1.bf16.msra.mxu0 %v1836_v26  ;;  %v1934_v26 = vld [vmem:[%s2664_s2 + $0x74] ss:$24 sps:$4 sm:$0xff]  }
  0x66   :  { %1343 = vmatpush1.bf16.msra.mxu1 %v1839_v27  ;;  %1301 = vmatprep.subr.bf16.mxu0 %v1844_v28  ;;  %v1937_v27 = vld [vmem:[%s2664_s2 + $0x374] ss:$24 sps:$4 sm:$0xff]   ;;  %v1932_v28 = vld [vmem:[%s2664_s2 + $0x70] ss:$24 sps:$4 sm:$0xff]  }
  0x67   :  { %1344 = vmatprep.subr.bf16.mxu1 %v1847_v29  ;;  %v1935_v29 = vld [vmem:[%s2664_s2 + $0x370] ss:$24 sps:$4 sm:$0xff]  }
  0x69   :  { %1302 = vmatpush1.bf16.msra.mxu0 %v1842_v30  ;;  %v1940_v30 = vld [vmem:[%s2664_s2 + $0x44] ss:$24 sps:$4 sm:$0xff]  }
  0x6a   :  { %1345 = vmatpush1.bf16.msra.mxu1 %v1845_v31  ;;  %1303 = vmatprep.subr.bf16.mxu0 %v1850_v32  ;;  %v1943_v31 = vld [vmem:[%s2664_s2 + $0x344] ss:$24 sps:$4 sm:$0xff]   ;;  %v1938_v32 = vld [vmem:[%s2664_s2 + $0x40] ss:$24 sps:$4 sm:$0xff]  }
  0x6b   :  { %1346 = vmatprep.subr.bf16.mxu1 %v1853_v33  ;;  %v1941_v33 = vld [vmem:[%s2664_s2 + $0x340] ss:$24 sps:$4 sm:$0xff]  }
  0x6d   :  { %1304 = vmatpush1.bf16.msra.mxu0 %v1848_v34  ;;  %v1946_v34 = vld [vmem:[%s2664_s2 + $0x14] ss:$24 sps:$4 sm:$0xff]  }
  0x6e   :  { %1347 = vmatpush1.bf16.msra.mxu1 %v1851_v35  ;;  %1305 = vmatprep.subr.bf16.mxu0 %v1856_v36  ;;  %v1949_v35 = vld [vmem:[%s2664_s2 + $0x314] ss:$24 sps:$4 sm:$0xff]   ;;  %v1944_v36 = vld [vmem:[%s2664_s2 + $0x10] ss:$24 sps:$4 sm:$0xff]  }
  0x6f   :  { %1348 = vmatprep.subr.bf16.mxu1 %v1859_v37  ;;  %v1947_v37 = vld [vmem:[%s2664_s2 + $0x310] ss:$24 sps:$4 sm:$0xff]  }
  0x71   :  { %1306 = vmatpush2.bf16.msra.mxu0 %v1854_v38  ;;  %v1952_v38 = vld [vmem:[%s2664_s2 + $0x2e4] ss:$24 sps:$4 sm:$0xff]  }
  0x72   :  { %1349 = vmatpush2.bf16.msra.mxu1 %v1857_v39  ;;  %1307 = vmatprep.subr.bf16.mxu0 %v1862_v40  ;;  %v1955_v39 = vld [vmem:[%s2664_s2 + $0x5e4] ss:$24 sps:$4 sm:$0xff]   ;;  %v1950_v40 = vld [vmem:[%s2664_s2 + $0x2e0] ss:$24 sps:$4 sm:$0xff]  }
  0x73   :  { %1350 = vmatprep.subr.bf16.mxu1 %v1865_v41  ;;  %v1953_v41 = vld [vmem:[%s2664_s2 + $0x5e0] ss:$24 sps:$4 sm:$0xff]  }
  0x75   :  { %1308 = vmatpush2.bf16.msra.mxu0 %v1860_v42  ;;  %v1958_v42 = vld [vmem:[%s2664_s2 + $0x2b4] ss:$24 sps:$4 sm:$0xff]  }
  0x76   :  { %1351 = vmatpush2.bf16.msra.mxu1 %v1863_v43  ;;  %1309 = vmatprep.subr.bf16.mxu0 %v1868_v44  ;;  %v1961_v43 = vld [vmem:[%s2664_s2 + $0x5b4] ss:$24 sps:$4 sm:$0xff]   ;;  %v1956_v44 = vld [vmem:[%s2664_s2 + $0x2b0] ss:$24 sps:$4 sm:$0xff]  }
  0x77   :  { %1352 = vmatprep.subr.bf16.mxu1 %v1871_v45  ;;  %v1959_v45 = vld [vmem:[%s2664_s2 + $0x5b0] ss:$24 sps:$4 sm:$0xff]  }
  0x79   :  { %1310 = vmatpush2.bf16.msra.mxu0 %v1866_v46  ;;  %v1964_v46 = vld [vmem:[%s2664_s2 + $0x284] ss:$24 sps:$4 sm:$0xff]  }
  0x7a   :  { %1353 = vmatpush2.bf16.msra.mxu1 %v1869_v47  ;;  %1311 = vmatprep.subr.bf16.mxu0 %v1874_v49  ;;  %v1967_v47 = vld [vmem:[%s2664_s2 + $0x584] ss:$24 sps:$4 sm:$0xff]   ;;  %v1962_v49 = vld [vmem:[%s2664_s2 + $0x280] ss:$24 sps:$4 sm:$0xff]  }
  0x7b   :  { %1354 = vmatprep.subr.bf16.mxu1 %v1877_v51  ;;  %v1965_v51 = vld [vmem:[%s2664_s2 + $0x580] ss:$24 sps:$4 sm:$0xff]  }
  0x7d   :  { %1312 = vmatpush2.bf16.msra.mxu0 %v1872_v52  ;;  %v1970_v52 = vld [vmem:[%s2664_s2 + $0x254] ss:$24 sps:$4 sm:$0xff]  }
  0x7e   :  { %1355 = vmatpush2.bf16.msra.mxu1 %v1875_v53  ;;  %1313 = vmatprep.subr.bf16.mxu0 %v1880_v54  ;;  %v1973_v53 = vld [vmem:[%s2664_s2 + $0x554] ss:$24 sps:$4 sm:$0xff]   ;;  %v1968_v54 = vld [vmem:[%s2664_s2 + $0x250] ss:$24 sps:$4 sm:$0xff]  }
  0x7f   :  { %1356 = vmatprep.subr.bf16.mxu1 %v1883_v55  ;;  %v1971_v55 = vld [vmem:[%s2664_s2 + $0x550] ss:$24 sps:$4 sm:$0xff]  }
  0x81   :  { %1314 = vmatpush2.bf16.msra.mxu0 %v1878_v56  ;;  %v1976_v56 = vld [vmem:[%s2664_s2 + $0x224] ss:$24 sps:$4 sm:$0xff]  }
  0x82   :  { %1357 = vmatpush2.bf16.msra.mxu1 %v1881_v57  ;;  %1315 = vmatprep.subr.bf16.mxu0 %v1886_v58  ;;  %v1979_v57 = vld [vmem:[%s2664_s2 + $0x524] ss:$24 sps:$4 sm:$0xff]   ;;  %v1974_v58 = vld [vmem:[%s2664_s2 + $0x220] ss:$24 sps:$4 sm:$0xff]  }
  0x83   :  { %1358 = vmatprep.subr.bf16.mxu1 %v1889_v59  ;;  %v1977_v59 = vld [vmem:[%s2664_s2 + $0x520] ss:$24 sps:$4 sm:$0xff]  }
  0x85   :  { %1316 = vmatpush2.bf16.msra.mxu0 %v1884_v60  ;;  %v1982_v60 = vld [vmem:[%s2664_s2 + $0x1f4] ss:$24 sps:$4 sm:$0xff]  }
  0x86   :  { %1359 = vmatpush2.bf16.msra.mxu1 %v1887_v61  ;;  %1317 = vmatprep.subr.bf16.mxu0 %v1892_v62  ;;  %v1985_v61 = vld [vmem:[%s2664_s2 + $0x4f4] ss:$24 sps:$4 sm:$0xff]   ;;  %v1980_v62 = vld [vmem:[%s2664_s2 + $0x1f0] ss:$24 sps:$4 sm:$0xff]  }
  0x87   :  { %1360 = vmatprep.subr.bf16.mxu1 %v1895_v63  ;;  %v1983_v63 = vld [vmem:[%s2664_s2 + $0x4f0] ss:$24 sps:$4 sm:$0xff]  }
  0x89   :  { %1318 = vmatpush2.bf16.msra.mxu0 %v1890_v0  ;;  %v1988_v0 = vld [vmem:[%s2664_s2 + $0x1c4] ss:$24 sps:$4 sm:$0xff]  }
  0x8a   :  { %1361 = vmatpush2.bf16.msra.mxu1 %v1893_v1  ;;  %1319 = vmatprep.subr.bf16.mxu0 %v1898_v2  ;;  %v1991_v1 = vld [vmem:[%s2664_s2 + $0x4c4] ss:$24 sps:$4 sm:$0xff]   ;;  %v1986_v2 = vld [vmem:[%s2664_s2 + $0x1c0] ss:$24 sps:$4 sm:$0xff]  }
  0x8b   :  { %1362 = vmatprep.subr.bf16.mxu1 %v1901_v3  ;;  %v1989_v3 = vld [vmem:[%s2664_s2 + $0x4c0] ss:$24 sps:$4 sm:$0xff]  }
  0x8d   :  { %1320 = vmatpush2.bf16.msra.mxu0 %v1896_v6  ;;  %v1994_v6 = vld [vmem:[%s2664_s2 + $0x194] ss:$24 sps:$4 sm:$0xff]  }
  0x8e   :  { %1363 = vmatpush2.bf16.msra.mxu1 %v1899_v7  ;;  %1375 = vmatprep.subr.bf16.mxu0 %v1904_v8  ;;  %v1997_v7 = vld [vmem:[%s2664_s2 + $0x494] ss:$24 sps:$4 sm:$0xff]   ;;  %v1992_v8 = vld [vmem:[%s2664_s2 + $0x190] ss:$24 sps:$4 sm:$0xff]  }
  0x8f   :  { %1418 = vmatprep.subr.bf16.mxu1 %v1907_v9  ;;  %v1995_v9 = vld [vmem:[%s2664_s2 + $0x490] ss:$24 sps:$4 sm:$0xff]  }
  0x90   :  { %1322 = vmatmul.mubr.bf16.vlgmr.msra.gmra.mxu0 %v2249_v4 }
  0x91   :  { %1365 = vmatmul.mubr.bf16.vlgmr.msra.gmra.mxu1 %v2254_v5  ;;  %1376 = vmatpush1.bf16.msra.mxu0 %v1902_v10 }
  0x92   :  { %1419 = vmatpush1.bf16.msra.mxu1 %v1905_v11  ;;  %1377 = vmatprep.subr.bf16.mxu0 %v1910_v12 }
  0x93   :  { %1420 = vmatprep.subr.bf16.mxu1 %v1913_v13  ;;  %1407 = vmatprep.mubr.bf16.mxu0 %v2183_v48  ;;  %v1925_v48 = vld [vmem:[%s2664_s2 + $0x3d4] ss:$24 sps:$4 sm:$0xff]  }
  0x94   :  { %1450 = vmatprep.mubr.bf16.mxu1 %v2191_v50  ;;  %v1920_v50 = vld [vmem:[%s2664_s2 + $0xd0] ss:$24 sps:$4 sm:$0xff]   ;;  %s1702_s2 = sld [smem:[#allocation2 + $0x1]] }
  0x95   :  { %1378 = vmatpush1.bf16.msra.mxu0 %v1908_v14 }
  0x96   :  { %1421 = vmatpush1.bf16.msra.mxu1 %v1911_v15  ;;  %1379 = vmatprep.subr.bf16.mxu0 %v1916_v16 }
  0x97   :  { %1422 = vmatprep.subr.bf16.mxu1 %v1919_v17 }
  0x99   :  { %1380 = vmatpush1.bf16.msra.mxu0 %v1914_v18 }
  0x9a   :  { %1423 = vmatpush1.bf16.msra.mxu1 %v1917_v19  ;;  %1381 = vmatprep.subr.bf16.mxu0 %v1922_v20 }
  0x9b   :  { %1424 = vmatprep.subr.bf16.mxu1 %v1925_v48 }
  0x9d   :  { %1382 = vmatpush1.bf16.msra.mxu0 %v1920_v50 }
  0x9e   :  { %1425 = vmatpush1.bf16.msra.mxu1 %v1923_v21  ;;  %1383 = vmatprep.subr.bf16.mxu0 %v1928_v22 }
  0x9f   :  { %1426 = vmatprep.subr.bf16.mxu1 %v1931_v23 }
  0xa1   :  { %1384 = vmatpush1.bf16.msra.mxu0 %v1926_v24 }
  0xa2   :  { %1427 = vmatpush1.bf16.msra.mxu1 %v1929_v25  ;;  %1385 = vmatprep.subr.bf16.mxu0 %v1934_v26 }
  0xa3   :  { %1428 = vmatprep.subr.bf16.mxu1 %v1937_v27 }
  0xa5   :  { %1386 = vmatpush1.bf16.msra.mxu0 %v1932_v28 }
  0xa6   :  { %1429 = vmatpush1.bf16.msra.mxu1 %v1935_v29  ;;  %1387 = vmatprep.subr.bf16.mxu0 %v1940_v30  ;;  %v1480_v29 = vstv %s1479_s8 }
  0xa7   :  { %1430 = vmatprep.subr.bf16.mxu1 %v1943_v31 }
  0xa9   :  { %1388 = vmatpush1.bf16.msra.mxu0 %v1938_v32 }
  0xaa   :  { %1431 = vmatpush1.bf16.msra.mxu1 %v1941_v33  ;;  %1389 = vmatprep.subr.bf16.mxu0 %v1946_v34  ;;  %v1488_v34 = vstv %s1702_s2 }
  0xab   :  { %1432 = vmatprep.subr.bf16.mxu1 %v1949_v35 }
  0xad   :  { %1390 = vmatpush1.bf16.msra.mxu0 %v1944_v36 }
  0xae   :  { %1433 = vmatpush1.bf16.msra.mxu1 %v1947_v37  ;;  %1391 = vmatprep.subr.bf16.mxu0 %v1952_v38 }
  0xaf   :  { %1434 = vmatprep.subr.bf16.mxu1 %v1955_v39 }
  0xb1   :  { %1392 = vmatpush2.bf16.msra.mxu0 %v1950_v40 }
  0xb2   :  { %1435 = vmatpush2.bf16.msra.mxu1 %v1953_v41  ;;  %1393 = vmatprep.subr.bf16.mxu0 %v1958_v42 }
  0xb3   :  { %1436 = vmatprep.subr.bf16.mxu1 %v1961_v43 }
  0xb5   :  { %1394 = vmatpush2.bf16.msra.mxu0 %v1956_v44 }
  0xb6   :  { %1437 = vmatpush2.bf16.msra.mxu1 %v1959_v45  ;;  %1395 = vmatprep.subr.bf16.mxu0 %v1964_v46 }
  0xb7   :  { %1438 = vmatprep.subr.bf16.mxu1 %v1967_v47 }
  0xb9   :  { %1396 = vmatpush2.bf16.msra.mxu0 %v1962_v49 }
  0xba   :  { %1439 = vmatpush2.bf16.msra.mxu1 %v1965_v51  ;;  %1397 = vmatprep.subr.bf16.mxu0 %v1970_v52 }
  0xbb   :  { %1440 = vmatprep.subr.bf16.mxu1 %v1973_v53 }
  0xbd   :  { %1398 = vmatpush2.bf16.msra.mxu0 %v1968_v54 }
  0xbe   :  { %1441 = vmatpush2.bf16.msra.mxu1 %v1971_v55  ;;  %1399 = vmatprep.subr.bf16.mxu0 %v1976_v56 }
  0xbf   :  { %1442 = vmatprep.subr.bf16.mxu1 %v1979_v57 }
  0xc1   :  { %1400 = vmatpush2.bf16.msra.mxu0 %v1974_v58 }
  0xc2   :  { %1443 = vmatpush2.bf16.msra.mxu1 %v1977_v59  ;;  %1401 = vmatprep.subr.bf16.mxu0 %v1982_v60 }
  0xc3   :  { %1444 = vmatprep.subr.bf16.mxu1 %v1985_v61 }
  0xc5   :  { %1402 = vmatpush2.bf16.msra.mxu0 %v1980_v62 }
  0xc6   :  { %1445 = vmatpush2.bf16.msra.mxu1 %v1983_v63  ;;  %1403 = vmatprep.subr.bf16.mxu0 %v1988_v0 }
  0xc7   :  { %1446 = vmatprep.subr.bf16.mxu1 %v1991_v1 }
  0xc9   :  { %1404 = vmatpush2.bf16.msra.mxu0 %v1986_v2 }
  0xca   :  { %1447 = vmatpush2.bf16.msra.mxu1 %v1989_v3  ;;  %1405 = vmatprep.subr.bf16.mxu0 %v1994_v6 }
  0xcb   :  { %1448 = vmatprep.subr.bf16.mxu1 %v1997_v7 }
  0xcd   :  { %1406 = vmatpush2.bf16.msra.mxu0 %v1992_v8 }
  0xce   :  { %1449 = vmatpush2.bf16.msra.mxu1 %v1995_v9 }
  0xd0   :  { %1408 = vmatmul.mubr.bf16.vlgmr.msra.gmra.mxu0 %v2249_v4 }
  0xd1   :  { %1451 = vmatmul.mubr.bf16.vlgmr.msra.gmra.mxu1 %v2254_v5 }
 0x110   :  { %v1237_v10 = vpop.f32.mrf.mxu0 }
 0x111   :  { %v1280_v11 = vpop.f32.mrf.mxu1 }
 0x112   :  { %v1239_v12 = vpop.f32.mrf.mxu0  ;;  %v1281_v50 = vadd.f32 %v1280_v11, %v1237_v10 }
 0x113   :  { %v1282_v13 = vpop.f32.mrf.mxu1 }
 0x114   :  { %v1283_v14 = vadd.f32 %v1282_v13, %v1239_v12  ;;  %v1241_v15 = vpop.f32.mrf.mxu0  ;;  %v1461_v25 = vmul.f32 %v1281_v50, %v1281_v50 }
 0x115   :  { %v1284_v16 = vpop.f32.mrf.mxu1 }
 0x116   :  { %v1243_v17 = vpop.f32.mrf.mxu0  ;;  %v1285_v26 = vadd.f32 %v1284_v16, %v1241_v15  ;;  %v1462_v47 = vmul.f32 %v1283_v14, %v1283_v14 }
 0x117   :  { %v1286_v18 = vpop.f32.mrf.mxu1 }
 0x118   :  { %v1287_v19 = vadd.f32 %v1286_v18, %v1243_v17  ;;  %v1464_v35 = vmul.f32 %v1285_v26, %v1285_v26 }
 0x11a   :  { %v1465_v58 = vmul.f32 %v1287_v19, %v1287_v19 }
 0x150   :  { %v1323_v20 = vpop.f32.mrf.mxu0 }
 0x151   :  { %v1366_v48 = vpop.f32.mrf.mxu1 }
 0x152   :  { %v1367_v21 = vadd.f32 %v1366_v48, %v1323_v20  ;;  %v1325_v22 = vpop.f32.mrf.mxu0 }
 0x153   :  { %v1368_v4 = vpop.f32.mrf.mxu1 }
 0x154   :  { %v1369_v23 = vadd.f32 %v1368_v4, %v1325_v22  ;;  %v1327_v5 = vpop.f32.mrf.mxu0  ;;  %v1463_v54 = vmul.f32 %v1367_v21, %v1367_v21 }
 0x155   :  { %v1370_v24 = vpop.f32.mrf.mxu1 }
 0x156   :  { %v1467_v27 = vmul.f32 %v1369_v23, %v1369_v23  ;;  %v1371_v28 = vadd.f32 %v1370_v24, %v1327_v5  ;;  %v1329_v30 = vpop.f32.mrf.mxu0 }
 0x157   :  { %v1372_v31 = vpop.f32.mrf.mxu1 }
 0x158   :  { %v1473_v32 = vadd.f32 %v1467_v27, %v1461_v25  ;;  %v1373_v33 = vadd.f32 %v1372_v31, %v1329_v30  ;;  %v1466_v1 = vmul.f32 %v1371_v28, %v1371_v28 }
 0x15a   :  { %v1481_v36 = vsub.f32 %v1473_v32, %v1480_v29  ;;  %v1470_v37 = vmul.f32 %v1373_v33, %v1373_v33 }
 0x15c   :  { %v1489_v38 = vmul.f32 %v1488_v34, %v1481_v36  ;;  %v1476_v39 = vadd.f32 %v1470_v37, %v1464_v35 }
 0x15e   :  { %1495 = vst [vmem:[%s2665_s3] sm:$0xff] %v1489_v38  ;;  %v1484_v40 = vsub.f32 %v1476_v39, %v1480_v29 }
 0x160   :  { %v1492_v41 = vmul.f32 %v1488_v34, %v1484_v40 }
 0x162   :  { %1498 = vst [vmem:[%s2665_s3 + $0x18] sm:$0xff] %v1492_v41 }
 0x190   :  { %v1409_v42 = vpop.f32.mrf.mxu0 }
 0x191   :  { %v1452_v43 = vpop.f32.mrf.mxu1 }
 0x192   :  { %v1453_v44 = vadd.f32 %v1452_v43, %v1409_v42  ;;  %v1411_v45 = vpop.f32.mrf.mxu0 }
 0x193   :  { %v1454_v46 = vpop.f32.mrf.mxu1 }
 0x194   :  { %v1468_v49 = vmul.f32 %v1453_v44, %v1453_v44  ;;  %v1455_v51 = vadd.f32 %v1454_v46, %v1411_v45  ;;  %v1413_v52 = vpop.f32.mrf.mxu0 }
 0x195   :  { %v1456_v53 = vpop.f32.mrf.mxu1 }
 0x196   :  { %v1474_v55 = vadd.f32 %v1468_v49, %v1462_v47  ;;  %v1469_v56 = vmul.f32 %v1455_v51, %v1455_v51  ;;  %v1457_v57 = vadd.f32 %v1456_v53, %v1413_v52  ;;  %v1415_v59 = vpop.f32.mrf.mxu0 }
 0x197   :  { %v1458_v60 = vpop.f32.mrf.mxu1 }
 0x198   :  { %v1482_v61 = vsub.f32 %v1474_v55, %v1480_v29  ;;  %v1475_v62 = vadd.f32 %v1469_v56, %v1463_v54  ;;  %v1471_v63 = vmul.f32 %v1457_v57, %v1457_v57  ;;  %v1459_v0 = vadd.f32 %v1458_v60, %v1415_v59 }
 0x19a   :  { %v1490_v2 = vmul.f32 %v1488_v34, %v1482_v61  ;;  %v1483_v3 = vsub.f32 %v1475_v62, %v1480_v29  ;;  %v1477_v6 = vadd.f32 %v1471_v63, %v1465_v58  ;;  %v1472_v7 = vmul.f32 %v1459_v0, %v1459_v0 }
 0x19c   :  { %1496 = vst [vmem:[%s2665_s3 + $0x8] sm:$0xff] %v1490_v2  ;;  %v1491_v8 = vmul.f32 %v1488_v34, %v1483_v3  ;;  %v1485_v9 = vsub.f32 %v1477_v6, %v1480_v29  ;;  %v1478_v10 = vadd.f32 %v1472_v7, %v1466_v1 }
 0x19e   :  { %1497 = vst [vmem:[%s2665_s3 + $0x10] sm:$0xff] %v1491_v8  ;;  %v1493_v11 = vmul.f32 %v1488_v34, %v1485_v9  ;;  %v1486_v12 = vsub.f32 %v1478_v10, %v1480_v29 }
 0x1a0   :  { %1499 = vst [vmem:[%s2665_s3 + $0x20] sm:$0xff] %v1493_v11  ;;  %v1494_v13 = vmul.f32 %v1488_v34, %v1486_v12 }
 0x1a2   :  { %1500 = vst [vmem:[%s2665_s3 + $0x28] sm:$0xff] %v1494_v13 }
 0x1a3   :  { %1505 = vsyncpa [#allocation3], 1 }

</bundles_post_ra>
